<compile_context>
chip_gen: v7x
topology: tpu7x:2x2x1
jax: 0.10.0
libtpu: 0.0.40
codegen_flags: <defaults>
</compile_context>

<pallas_src>
import functools

import jax
import jax.numpy as jnp
from jax.experimental import pallas as pl
from jax.experimental.pallas import tpu as pltpu


def _block_kernel(x_ref,
                  dw1_ref, b1_ref, pw1_ref,
                  dw2_ref, b2_ref, pw2_ref, b3_ref,
                  out_ref, pad_ref, *, H, W, C, P, G):
    f32 = jnp.float32
    Bt = x_ref.shape[0]
    WC, WP = W * C, W * P
    GC, GP = G * C, G * P
    nG = W // G

    # Zero only the two halo rows of the shared (H+2, W*C) row-padded scratch.
    # The interior rows [1, H] are rewritten for every image / dwconv and the
    # halo rows are never written afterwards, so this stays correct across
    # grid steps and under megacore "parallel" (scratch is per-core).
    zrow = jnp.zeros((1, WC), f32)
    pad_ref[0:1, :] = zrow
    pad_ref[H + 1:H + 2, :] = zrow

    # Horizontal neighbour taps via XLU lane rolls (no lane-misaligned slices).
    # The w=0 / w=W-1 edge zeroing of the wrapped lanes is folded into the
    # packed depthwise weights, so no extra masking selects are needed.
    sh_wm1 = C          # (w-1) tap: data rolled toward higher lanes by C
    sh_wp1 = WC - C     # (w+1) tap: roll by -C  (expressed as a positive roll)

    def dw3x3(v, w_ref):
        """3x3 depthwise conv on one lane-folded image (H, W*C).
        w_ref: (3, 3, W*C) with BN scale and edge masks folded in."""
        pad_ref[1:H + 1, :] = v                         # aligned lane offset 0
        acc = None
        for ki in range(3):
            row = pad_ref[ki:ki + H, :]                 # row-shifted tap
            for kj, sh in ((1, 0), (0, sh_wm1), (2, sh_wp1)):
                tap = row if sh == 0 else pltpu.roll(row, sh, axis=1)
                term = tap * w_ref[ki, kj, :]
                acc = term if acc is None else acc + term   # first-tap init
        return acc

    def pwconv(h, w_ref):
        """1x1 conv as nG lane-aligned bf16 MXU matmuls with the small
        block-diagonal kron(I_G, pw) weight (G-fold zero inflation only,
        no activation relayout: slices sit on 128-lane boundaries)."""
        w = w_ref[...]                                  # (G*C, G*P) bf16
        parts = []
        for g in range(nG):
            a = h[:, g * GC:(g + 1) * GC].astype(jnp.bfloat16)
            parts.append(jnp.dot(a, w, preferred_element_type=f32))
        return parts[0] if nG == 1 else jnp.concatenate(parts, axis=-1)

    def body(b, carry):
        x_img = x_ref[b].astype(f32)                    # (H, W*C)
        h = dw3x3(x_img, dw1_ref) + b1_ref[...]         # dwconv1 + bn1 (scale folded)
        h = jnp.maximum(pwconv(h, pw1_ref), 0.0)        # pwconv1 + relu
        h = dw3x3(h, dw2_ref) + b2_ref[...]             # dwconv2 + bn2 (scale folded)
        h = pwconv(h, pw2_ref) + b3_ref[...]            # pwconv2 + bn3 (scale folded)
        h = h + x_ref[b].astype(f32)                    # identity residual (re-read)
        out_ref[b] = jnp.maximum(h, 0.0).astype(out_ref.dtype)   # relu + lane-dense store
        return carry

    jax.lax.fori_loop(0, Bt, body, 0)


def _pack_params(p, W, G):
    """Re-layout logical parameters for the lane-folded kernel layout.
    In a stacked network this runs once at parameter-load time."""
    C = p["dw1"].shape[-1]
    WC = W * C

    lane = jnp.arange(WC)
    # kj=0 reads the (w-1) neighbour -> output lanes of w == 0   must be 0.
    # kj=2 reads the (w+1) neighbour -> output lanes of w == W-1 must be 0.
    kj_mask = jnp.stack([lane >= C,
                         jnp.ones((WC,), dtype=bool),
                         lane < (W - 1) * C], axis=0)            # (3, W*C)

    def pack_dw(dw, bn_scale):
        wt = dw * bn_scale[0]                        # fold BN scale  (3,3,C)
        wt = jnp.tile(wt, (1, 1, W))                 # lane-fold      (3,3,W*C)
        return wt * kj_mask[None].astype(wt.dtype)   # fold edge zeroing

    def pack_pw(pw, out_scale=None):
        if out_scale is not None:
            pw = pw * out_scale[0][None, :]          # fold bn3 scale into columns
        pw = jnp.kron(jnp.eye(G, dtype=pw.dtype), pw)   # (G*C, G*P) block-diag
        return pw.astype(jnp.bfloat16)               # MXU-native operand

    tile_bias = lambda b: jnp.tile(b, (1, W))        # (1, C) -> (1, W*C)
    return dict(
        dw1=pack_dw(p["dw1"], p["bn1_scale"]),
        dw2=pack_dw(p["dw2"], p["bn2_scale"]),
        pw1=pack_pw(p["pw1"]),
        pw2=pack_pw(p["pw2"], p["bn3_scale"]),
        b1=tile_bias(p["bn1_bias"]),
        b2=tile_bias(p["bn2_bias"]),
        b3=tile_bias(p["bn3_bias"]),
    )


def depthwise_basic_block_nhwc(x, params, *, block_batch=None):
    """x: (B, H, W, C) float32 NHWC.  Returns (B, H, W, P) float32."""
    B, H, W, C = x.shape
    P = params["pw1"].shape[1]
    if P != C:
        raise ValueError(
            "identity residual path requires planes == inplanes (stride=1)")
    # Lane-group size for the pointwise matmuls: fold G width positions so one
    # small (G*C, G*P) block-diagonal weight spans 128 lanes.
    G = 128 // C if (C <= 128 and 128 % C == 0
                     and W % max(1, 128 // C) == 0) else 1
    if block_batch is None:
        # Per-image register pressure is bounded by the in-kernel loop, so the
        # block size only trades per-grid-step overhead amortization against
        # keeping several grid steps per core for DMA/compute overlap.
        block_batch = max(1, min(8, B // 4))
    bt = block_batch
    if B % bt != 0:
        raise ValueError(f"batch {B} must be divisible by block_batch {bt}")
    WC, WP = W * C, W * P
    GC, GP = G * C, G * P

    kp = _pack_params(params, W, G)
    kern = functools.partial(_block_kernel, H=H, W=W, C=C, P=P, G=G)

    # Real (non-zero-padded) work for XLA's scheduler.
    flops = 2 * B * H * W * (9 * C + 9 * P + C * P + P * P)
    weight_bytes = 9 * (WC + WP) * 4 + (GC * GP + GP * GP) * 2 + 3 * WP * 4
    bytes_accessed = 4 * B * H * (WC + WP) + weight_bytes

    out = pl.pallas_call(
        kern,
        out_shape=jax.ShapeDtypeStruct((B, H, WP), jnp.float32),
        grid=(B // bt,),
        in_specs=[
            pl.BlockSpec((bt, H, WC), lambda g: (g, 0, 0)),   # x (lane-folded)
            pl.BlockSpec((3, 3, WC), lambda g: (0, 0, 0)),    # dw1 (scale+mask folded)
            pl.BlockSpec((1, WC), lambda g: (0, 0)),          # bn1 bias
            pl.BlockSpec((GC, GP), lambda g: (0, 0)),         # pw1 kron (bf16)
            pl.BlockSpec((3, 3, WP), lambda g: (0, 0, 0)),    # dw2 (scale+mask folded)
            pl.BlockSpec((1, WP), lambda g: (0, 0)),          # bn2 bias
            pl.BlockSpec((GP, GP), lambda g: (0, 0)),         # pw2 kron (bn3 scale, bf16)
            pl.BlockSpec((1, WP), lambda g: (0, 0)),          # bn3 bias
        ],
        out_specs=pl.BlockSpec((bt, H, WP), lambda g: (g, 0, 0)),
        scratch_shapes=[
            # Row-padded (lane offset 0) per-image halo scratch, shared by both
            # depthwise convs (P == C) and reused across the in-kernel loop.
            pltpu.VMEM((H + 2, WC), jnp.float32),
        ],
        compiler_params=pltpu.CompilerParams(
            dimension_semantics=("parallel",)),   # batch blocks independent
        cost_estimate=pl.CostEstimate(flops=flops, transcendentals=0,
                                      bytes_accessed=bytes_accessed),
    )(x.reshape(B, H, WC),
      kp["dw1"], kp["b1"], kp["pw1"],
      kp["dw2"], kp["b2"], kp["pw2"], kp["b3"])

    return out.reshape(B, H, W, P)


def depthwise_basic_block(x_nchw, params, *, block_batch=None):
    """NCHW boundary wrapper matching the PyTorch interface.

    For stacked blocks, keep activations NHWC and call
    depthwise_basic_block_nhwc directly (transpose once at network edges)."""
    x = jnp.transpose(x_nchw, (0, 2, 3, 1))               # -> NHWC
    y = depthwise_basic_block_nhwc(x, params, block_batch=block_batch)
    return jnp.transpose(y, (0, 3, 1, 2))                 # -> NCHW


# ------------------------- pure-JAX reference ------------------------- #
def _ref_dwconv(x, w):
    # x: (B, H, W, C), w: (3, 3, C)
    B, H, W, C = x.shape
    xp = jnp.pad(x, ((0, 0), (1, 1), (1, 1), (0, 0)))
    out = jnp.zeros_like(x)
    for ki in range(3):
        for kj in range(3):
            out = out + xp[:, ki:ki + H, kj:kj + W, :] * w[ki, kj, :]
    return out


def reference(x_nchw, p):
    x = jnp.transpose(x_nchw, (0, 2, 3, 1))
    h = _ref_dwconv(x, p["dw1"])
    h = h * p["bn1_scale"][0] + p["bn1_bias"][0]
    h = jnp.einsum("bhwc,cp->bhwp", h, p["pw1"])
    h = jnp.maximum(h, 0.0)
    h = _ref_dwconv(h, p["dw2"])
    h = h * p["bn2_scale"][0] + p["bn2_bias"][0]
    h = jnp.einsum("bhwc,cp->bhwp", h, p["pw2"])
    h = h * p["bn3_scale"][0] + p["bn3_bias"][0]
    h = jnp.maximum(h + x, 0.0)
    return jnp.transpose(h, (0, 3, 1, 2))


# ------------------------- deterministic params ------------------------- #
def make_params(key, inplanes, planes, eps=1e-5):
    ks = jax.random.split(key, 16)

    def folded_bn(k, n):
        kg, kb, km, kv = jax.random.split(k, 4)
        gamma = jax.random.uniform(kg, (n,), jnp.float32, 0.5, 1.5)
        beta = 0.1 * jax.random.normal(kb, (n,), jnp.float32)
        mean = 0.1 * jax.random.normal(km, (n,), jnp.float32)
        var = jax.random.uniform(kv, (n,), jnp.float32, 0.5, 1.5)
        scale = gamma / jnp.sqrt(var + eps)
        bias = beta - mean * scale
        return scale.reshape(1, n), bias.reshape(1, n)

    bn1s, bn1b = folded_bn(ks[0], inplanes)
    bn2s, bn2b = folded_bn(ks[1], planes)
    bn3s, bn3b = folded_bn(ks[2], planes)
    return {
        # PyTorch dwconv weight is (C, 1, 3, 3); stored here as (3, 3, C).
        "dw1": 0.1 * jax.random.normal(ks[3], (3, 3, inplanes), jnp.float32),
        "dw2": 0.1 * jax.random.normal(ks[4], (3, 3, planes), jnp.float32),
        # PyTorch 1x1 conv weight is (P, C, 1, 1); stored here as (C, P).
        "pw1": 0.1 * jax.random.normal(ks[5], (inplanes, planes), jnp.float32),
        "pw2": 0.1 * jax.random.normal(ks[6], (planes, planes), jnp.float32),
        "bn1_scale": bn1s, "bn1_bias": bn1b,
        "bn2_scale": bn2s, "bn2_bias": bn2b,
        "bn3_scale": bn3s, "bn3_bias": bn3b,
    }


if __name__ == "__main__":
    B, C, H, W = 8, 32, 16, 16          # inplanes = planes = 32, stride = 1
    P = 32

    key = jax.random.PRNGKey(0)
    kx, kp = jax.random.split(key)
    x = jax.random.normal(kx, (B, C, H, W), jnp.float32)
    params = make_params(kp, C, P)

    # block_batch=2 -> grid=(4,): 2 images per step, 4 pipelined grid steps.
    run = jax.jit(functools.partial(depthwise_basic_block,
                                    params=params, block_batch=2))
    out = run(x)
    jax.block_until_ready(out)

    ref = reference(x, params)
    assert out.shape == (B, P, H, W), out.shape
    err = float(jnp.max(jnp.abs(out - ref)))
    # bf16 MXU matmuls -> slightly relaxed tolerance vs the f32 reference.
    assert jnp.allclose(out, ref, rtol=3e-2, atol=3e-2), err

    print("KERNEL_OK")
</pallas_src>

<mosaic_0001>
module attributes {stable_mosaic.version = 11 : i64} {
  func.func @_block_kernel(%arg0: i32, %arg1: memref<2x16x512xf32, #tpu.memory_space<vmem>>, %arg2: memref<3x3x512xf32, #tpu.memory_space<vmem>>, %arg3: memref<1x512xf32, #tpu.memory_space<vmem>>, %arg4: memref<128x128xbf16, #tpu.memory_space<vmem>>, %arg5: memref<3x3x512xf32, #tpu.memory_space<vmem>>, %arg6: memref<1x512xf32, #tpu.memory_space<vmem>>, %arg7: memref<128x128xbf16, #tpu.memory_space<vmem>>, %arg8: memref<1x512xf32, #tpu.memory_space<vmem>>, %arg9: memref<2x16x512xf32, #tpu.memory_space<vmem>>, %arg10: memref<18x512xf32, #tpu.memory_space<vmem>>) attributes {dimension_semantics = [#tpu.dimension_semantics<parallel>], iteration_bounds = array<i64: 4>, scalar_prefetch = 0 : i64, scratch_operands = 1 : i64, tpu.core_type = #tpu.core_type<tc>, window_params = [{transform_indices = @transform_0, window_bounds = array<i64: 2, 16, 512>}, {pipeline_mode = #tpu.pipeline_mode<synchronous>, transform_indices = @transform_1, window_bounds = array<i64: 3, 3, 512>}, {pipeline_mode = #tpu.pipeline_mode<synchronous>, transform_indices = @transform_2, window_bounds = array<i64: 1, 512>}, {pipeline_mode = #tpu.pipeline_mode<synchronous>, transform_indices = @transform_3, window_bounds = array<i64: 128, 128>}, {pipeline_mode = #tpu.pipeline_mode<synchronous>, transform_indices = @transform_4, window_bounds = array<i64: 3, 3, 512>}, {pipeline_mode = #tpu.pipeline_mode<synchronous>, transform_indices = @transform_5, window_bounds = array<i64: 1, 512>}, {pipeline_mode = #tpu.pipeline_mode<synchronous>, transform_indices = @transform_6, window_bounds = array<i64: 128, 128>}, {pipeline_mode = #tpu.pipeline_mode<synchronous>, transform_indices = @transform_7, window_bounds = array<i64: 1, 512>}, {transform_indices = @transform_8, window_bounds = array<i64: 2, 16, 512>}]} {
    %cst = arith.constant 0.000000e+00 : f32
    %0 = vector.broadcast %cst : f32 to vector<1x512xf32>
    %c0 = arith.constant 0 : index
    %c0_0 = arith.constant 0 : index
    %1 = vector.load %arg10[%c0, %c0_0] : memref<18x512xf32, #tpu.memory_space<vmem>>, vector<1x512xf32>
    tpu.vector_store %arg10[%c0, %c0_0], %0 {strides = array<i32>} : memref<18x512xf32, #tpu.memory_space<vmem>>, vector<1x512xf32>,
    %c17 = arith.constant 17 : index
    %c0_1 = arith.constant 0 : index
    %2 = vector.load %arg10[%c17, %c0_1] : memref<18x512xf32, #tpu.memory_space<vmem>>, vector<1x512xf32>
    tpu.vector_store %arg10[%c17, %c0_1], %0 {strides = array<i32>} : memref<18x512xf32, #tpu.memory_space<vmem>>, vector<1x512xf32>,
    %c0_i32 = arith.constant 0 : i32
    %c2_i32 = arith.constant 2 : i32
    %3 = arith.addi %c0_i32, %c2_i32 : i32
    %c1_i32 = arith.constant 1 : i32
    scf.for %arg11 = %c0_i32 to %3 step %c1_i32  : i32 {
      %4 = arith.index_cast %arg11 : i32 to index
      %c0_3 = arith.constant 0 : index
      %c0_4 = arith.constant 0 : index
      %5 = vector.load %arg1[%4, %c0_3, %c0_4] : memref<2x16x512xf32, #tpu.memory_space<vmem>>, vector<1x16x512xf32>
      %6 = vector.shape_cast %5 : vector<1x16x512xf32> to vector<16x512xf32>
      %c1 = arith.constant 1 : index
      %c0_5 = arith.constant 0 : index
      %7 = vector.load %arg10[%c1, %c0_5] : memref<18x512xf32, #tpu.memory_space<vmem>>, vector<16x512xf32>
      tpu.vector_store %arg10[%c1, %c0_5], %6 {strides = array<i32>} : memref<18x512xf32, #tpu.memory_space<vmem>>, vector<16x512xf32>,
      %c0_6 = arith.constant 0 : index
      %c0_7 = arith.constant 0 : index
      %8 = vector.load %arg10[%c0_6, %c0_7] : memref<18x512xf32, #tpu.memory_space<vmem>>, vector<16x512xf32>
      %c0_8 = arith.constant 0 : index
      %c1_9 = arith.constant 1 : index
      %c0_10 = arith.constant 0 : index
      %9 = vector.load %arg2[%c0_8, %c1_9, %c0_10] : memref<3x3x512xf32, #tpu.memory_space<vmem>>, vector<1x1x512xf32>
      %10 = vector.shape_cast %9 : vector<1x1x512xf32> to vector<512xf32>
      %11 = vector.shape_cast %10 : vector<512xf32> to vector<1x512xf32>
      %12 = vector.broadcast %11 : vector<1x512xf32> to vector<16x512xf32>
      %13 = arith.mulf %8, %12 : vector<16x512xf32>
      %c32_i32 = arith.constant 32 : i32
      %14 = tpu.dynamic_rotate %8 by %c32_i32 dim 1 : vector<16x512xf32>, i32 -> vector<16x512xf32>
      %c0_11 = arith.constant 0 : index
      %c0_12 = arith.constant 0 : index
      %c0_13 = arith.constant 0 : index
      %15 = vector.load %arg2[%c0_11, %c0_12, %c0_13] : memref<3x3x512xf32, #tpu.memory_space<vmem>>, vector<1x1x512xf32>
      %16 = vector.shape_cast %15 : vector<1x1x512xf32> to vector<512xf32>
      %17 = vector.shape_cast %16 : vector<512xf32> to vector<1x512xf32>
      %18 = vector.broadcast %17 : vector<1x512xf32> to vector<16x512xf32>
      %19 = arith.mulf %14, %18 : vector<16x512xf32>
      %20 = arith.addf %13, %19 : vector<16x512xf32>
      %c480_i32 = arith.constant 480 : i32
      %21 = tpu.dynamic_rotate %8 by %c480_i32 dim 1 : vector<16x512xf32>, i32 -> vector<16x512xf32>
      %c0_14 = arith.constant 0 : index
      %c2 = arith.constant 2 : index
      %c0_15 = arith.constant 0 : index
      %22 = vector.load %arg2[%c0_14, %c2, %c0_15] : memref<3x3x512xf32, #tpu.memory_space<vmem>>, vector<1x1x512xf32>
      %23 = vector.shape_cast %22 : vector<1x1x512xf32> to vector<512xf32>
      %24 = vector.shape_cast %23 : vector<512xf32> to vector<1x512xf32>
      %25 = vector.broadcast %24 : vector<1x512xf32> to vector<16x512xf32>
      %26 = arith.mulf %21, %25 : vector<16x512xf32>
      %27 = arith.addf %20, %26 : vector<16x512xf32>
      %c1_16 = arith.constant 1 : index
      %c0_17 = arith.constant 0 : index
      %28 = vector.load %arg10[%c1_16, %c0_17] : memref<18x512xf32, #tpu.memory_space<vmem>>, vector<16x512xf32>
      %c1_18 = arith.constant 1 : index
      %c1_19 = arith.constant 1 : index
      %c0_20 = arith.constant 0 : index
      %29 = vector.load %arg2[%c1_18, %c1_19, %c0_20] : memref<3x3x512xf32, #tpu.memory_space<vmem>>, vector<1x1x512xf32>
      %30 = vector.shape_cast %29 : vector<1x1x512xf32> to vector<512xf32>
      %31 = vector.shape_cast %30 : vector<512xf32> to vector<1x512xf32>
      %32 = vector.broadcast %31 : vector<1x512xf32> to vector<16x512xf32>
      %33 = arith.mulf %28, %32 : vector<16x512xf32>
      %34 = arith.addf %27, %33 : vector<16x512xf32>
      %c32_i32_21 = arith.constant 32 : i32
      %35 = tpu.dynamic_rotate %28 by %c32_i32_21 dim 1 : vector<16x512xf32>, i32 -> vector<16x512xf32>
      %c1_22 = arith.constant 1 : index
      %c0_23 = arith.constant 0 : index
      %c0_24 = arith.constant 0 : index
      %36 = vector.load %arg2[%c1_22, %c0_23, %c0_24] : memref<3x3x512xf32, #tpu.memory_space<vmem>>, vector<1x1x512xf32>
      %37 = vector.shape_cast %36 : vector<1x1x512xf32> to vector<512xf32>
      %38 = vector.shape_cast %37 : vector<512xf32> to vector<1x512xf32>
      %39 = vector.broadcast %38 : vector<1x512xf32> to vector<16x512xf32>
      %40 = arith.mulf %35, %39 : vector<16x512xf32>
      %41 = arith.addf %34, %40 : vector<16x512xf32>
      %c480_i32_25 = arith.constant 480 : i32
      %42 = tpu.dynamic_rotate %28 by %c480_i32_25 dim 1 : vector<16x512xf32>, i32 -> vector<16x512xf32>
      %c1_26 = arith.constant 1 : index
      %c2_27 = arith.constant 2 : index
      %c0_28 = arith.constant 0 : index
      %43 = vector.load %arg2[%c1_26, %c2_27, %c0_28] : memref<3x3x512xf32, #tpu.memory_space<vmem>>, vector<1x1x512xf32>
      %44 = vector.shape_cast %43 : vector<1x1x512xf32> to vector<512xf32>
      %45 = vector.shape_cast %44 : vector<512xf32> to vector<1x512xf32>
      %46 = vector.broadcast %45 : vector<1x512xf32> to vector<16x512xf32>
      %47 = arith.mulf %42, %46 : vector<16x512xf32>
      %48 = arith.addf %41, %47 : vector<16x512xf32>
      %c2_29 = arith.constant 2 : index
      %c0_30 = arith.constant 0 : index
      %49 = vector.load %arg10[%c2_29, %c0_30] : memref<18x512xf32, #tpu.memory_space<vmem>>, vector<16x512xf32>
      %c2_31 = arith.constant 2 : index
      %c1_32 = arith.constant 1 : index
      %c0_33 = arith.constant 0 : index
      %50 = vector.load %arg2[%c2_31, %c1_32, %c0_33] : memref<3x3x512xf32, #tpu.memory_space<vmem>>, vector<1x1x512xf32>
      %51 = vector.shape_cast %50 : vector<1x1x512xf32> to vector<512xf32>
      %52 = vector.shape_cast %51 : vector<512xf32> to vector<1x512xf32>
      %53 = vector.broadcast %52 : vector<1x512xf32> to vector<16x512xf32>
      %54 = arith.mulf %49, %53 : vector<16x512xf32>
      %55 = arith.addf %48, %54 : vector<16x512xf32>
      %c32_i32_34 = arith.constant 32 : i32
      %56 = tpu.dynamic_rotate %49 by %c32_i32_34 dim 1 : vector<16x512xf32>, i32 -> vector<16x512xf32>
      %c2_35 = arith.constant 2 : index
      %c0_36 = arith.constant 0 : index
      %c0_37 = arith.constant 0 : index
      %57 = vector.load %arg2[%c2_35, %c0_36, %c0_37] : memref<3x3x512xf32, #tpu.memory_space<vmem>>, vector<1x1x512xf32>
      %58 = vector.shape_cast %57 : vector<1x1x512xf32> to vector<512xf32>
      %59 = vector.shape_cast %58 : vector<512xf32> to vector<1x512xf32>
      %60 = vector.broadcast %59 : vector<1x512xf32> to vector<16x512xf32>
      %61 = arith.mulf %56, %60 : vector<16x512xf32>
      %62 = arith.addf %55, %61 : vector<16x512xf32>
      %c480_i32_38 = arith.constant 480 : i32
      %63 = tpu.dynamic_rotate %49 by %c480_i32_38 dim 1 : vector<16x512xf32>, i32 -> vector<16x512xf32>
      %c2_39 = arith.constant 2 : index
      %c2_40 = arith.constant 2 : index
      %c0_41 = arith.constant 0 : index
      %64 = vector.load %arg2[%c2_39, %c2_40, %c0_41] : memref<3x3x512xf32, #tpu.memory_space<vmem>>, vector<1x1x512xf32>
      %65 = vector.shape_cast %64 : vector<1x1x512xf32> to vector<512xf32>
      %66 = vector.shape_cast %65 : vector<512xf32> to vector<1x512xf32>
      %67 = vector.broadcast %66 : vector<1x512xf32> to vector<16x512xf32>
      %68 = arith.mulf %63, %67 : vector<16x512xf32>
      %69 = arith.addf %62, %68 : vector<16x512xf32>
      %c0_42 = arith.constant 0 : index
      %c0_43 = arith.constant 0 : index
      %70 = vector.load %arg3[%c0_42, %c0_43] : memref<1x512xf32, #tpu.memory_space<vmem>>, vector<1x512xf32>
      %71 = vector.broadcast %70 : vector<1x512xf32> to vector<16x512xf32>
      %72 = arith.addf %69, %71 : vector<16x512xf32>
      %c0_44 = arith.constant 0 : index
      %c0_45 = arith.constant 0 : index
      %73 = vector.load %arg4[%c0_44, %c0_45] : memref<128x128xbf16, #tpu.memory_space<vmem>>, vector<128x128xbf16>
      %74 = vector.extract_strided_slice %72 {offsets = [0, 0], sizes = [16, 128], strides = [1, 1]} : vector<16x512xf32> to vector<16x128xf32>
      %75 = arith.truncf %74 : vector<16x128xf32> to vector<16x128xbf16>
      %cst_46 = arith.constant dense<0.000000e+00> : vector<16x128xf32>
      %76 = tpu.matmul %75, %73, %cst_46 {dimension_numbers = #tpu.dot_dimension_numbers<[1], [0], [0], [1], [0, 0, 1, 1], [], []>} : vector<16x128xbf16>, vector<128x128xbf16>, vector<16x128xf32> -> vector<16x128xf32>
      %77 = vector.extract_strided_slice %72 {offsets = [0, 128], sizes = [16, 128], strides = [1, 1]} : vector<16x512xf32> to vector<16x128xf32>
      %78 = arith.truncf %77 : vector<16x128xf32> to vector<16x128xbf16>
      %cst_47 = arith.constant dense<0.000000e+00> : vector<16x128xf32>
      %79 = tpu.matmul %78, %73, %cst_47 {dimension_numbers = #tpu.dot_dimension_numbers<[1], [0], [0], [1], [0, 0, 1, 1], [], []>} : vector<16x128xbf16>, vector<128x128xbf16>, vector<16x128xf32> -> vector<16x128xf32>
      %80 = vector.extract_strided_slice %72 {offsets = [0, 256], sizes = [16, 128], strides = [1, 1]} : vector<16x512xf32> to vector<16x128xf32>
      %81 = arith.truncf %80 : vector<16x128xf32> to vector<16x128xbf16>
      %cst_48 = arith.constant dense<0.000000e+00> : vector<16x128xf32>
      %82 = tpu.matmul %81, %73, %cst_48 {dimension_numbers = #tpu.dot_dimension_numbers<[1], [0], [0], [1], [0, 0, 1, 1], [], []>} : vector<16x128xbf16>, vector<128x128xbf16>, vector<16x128xf32> -> vector<16x128xf32>
      %83 = vector.extract_strided_slice %72 {offsets = [0, 384], sizes = [16, 128], strides = [1, 1]} : vector<16x512xf32> to vector<16x128xf32>
      %84 = arith.truncf %83 : vector<16x128xf32> to vector<16x128xbf16>
      %cst_49 = arith.constant dense<0.000000e+00> : vector<16x128xf32>
      %85 = tpu.matmul %84, %73, %cst_49 {dimension_numbers = #tpu.dot_dimension_numbers<[1], [0], [0], [1], [0, 0, 1, 1], [], []>} : vector<16x128xbf16>, vector<128x128xbf16>, vector<16x128xf32> -> vector<16x128xf32>
      %86 = tpu.concatenate %76, %79, %82, %85 in 1 : vector<16x128xf32>, vector<16x128xf32>, vector<16x128xf32>, vector<16x128xf32> -> vector<16x512xf32>
      %cst_50 = arith.constant 0.000000e+00 : f32
      %87 = vector.broadcast %cst_50 : f32 to vector<16x512xf32>
      %88 = arith.maximumf %86, %87 : vector<16x512xf32>
      %c1_51 = arith.constant 1 : index
      %c0_52 = arith.constant 0 : index
      %89 = vector.load %arg10[%c1_51, %c0_52] : memref<18x512xf32, #tpu.memory_space<vmem>>, vector<16x512xf32>
      tpu.vector_store %arg10[%c1_51, %c0_52], %88 {strides = array<i32>} : memref<18x512xf32, #tpu.memory_space<vmem>>, vector<16x512xf32>,
      %c0_53 = arith.constant 0 : index
      %c0_54 = arith.constant 0 : index
      %90 = vector.load %arg10[%c0_53, %c0_54] : memref<18x512xf32, #tpu.memory_space<vmem>>, vector<16x512xf32>
      %c0_55 = arith.constant 0 : index
      %c1_56 = arith.constant 1 : index
      %c0_57 = arith.constant 0 : index
      %91 = vector.load %arg5[%c0_55, %c1_56, %c0_57] : memref<3x3x512xf32, #tpu.memory_space<vmem>>, vector<1x1x512xf32>
      %92 = vector.shape_cast %91 : vector<1x1x512xf32> to vector<512xf32>
      %93 = vector.shape_cast %92 : vector<512xf32> to vector<1x512xf32>
      %94 = vector.broadcast %93 : vector<1x512xf32> to vector<16x512xf32>
      %95 = arith.mulf %90, %94 : vector<16x512xf32>
      %c32_i32_58 = arith.constant 32 : i32
      %96 = tpu.dynamic_rotate %90 by %c32_i32_58 dim 1 : vector<16x512xf32>, i32 -> vector<16x512xf32>
      %c0_59 = arith.constant 0 : index
      %c0_60 = arith.constant 0 : index
      %c0_61 = arith.constant 0 : index
      %97 = vector.load %arg5[%c0_59, %c0_60, %c0_61] : memref<3x3x512xf32, #tpu.memory_space<vmem>>, vector<1x1x512xf32>
      %98 = vector.shape_cast %97 : vector<1x1x512xf32> to vector<512xf32>
      %99 = vector.shape_cast %98 : vector<512xf32> to vector<1x512xf32>
      %100 = vector.broadcast %99 : vector<1x512xf32> to vector<16x512xf32>
      %101 = arith.mulf %96, %100 : vector<16x512xf32>
      %102 = arith.addf %95, %101 : vector<16x512xf32>
      %c480_i32_62 = arith.constant 480 : i32
      %103 = tpu.dynamic_rotate %90 by %c480_i32_62 dim 1 : vector<16x512xf32>, i32 -> vector<16x512xf32>
      %c0_63 = arith.constant 0 : index
      %c2_64 = arith.constant 2 : index
      %c0_65 = arith.constant 0 : index
      %104 = vector.load %arg5[%c0_63, %c2_64, %c0_65] : memref<3x3x512xf32, #tpu.memory_space<vmem>>, vector<1x1x512xf32>
      %105 = vector.shape_cast %104 : vector<1x1x512xf32> to vector<512xf32>
      %106 = vector.shape_cast %105 : vector<512xf32> to vector<1x512xf32>
      %107 = vector.broadcast %106 : vector<1x512xf32> to vector<16x512xf32>
      %108 = arith.mulf %103, %107 : vector<16x512xf32>
      %109 = arith.addf %102, %108 : vector<16x512xf32>
      %c1_66 = arith.constant 1 : index
      %c0_67 = arith.constant 0 : index
      %110 = vector.load %arg10[%c1_66, %c0_67] : memref<18x512xf32, #tpu.memory_space<vmem>>, vector<16x512xf32>
      %c1_68 = arith.constant 1 : index
      %c1_69 = arith.constant 1 : index
      %c0_70 = arith.constant 0 : index
      %111 = vector.load %arg5[%c1_68, %c1_69, %c0_70] : memref<3x3x512xf32, #tpu.memory_space<vmem>>, vector<1x1x512xf32>
      %112 = vector.shape_cast %111 : vector<1x1x512xf32> to vector<512xf32>
      %113 = vector.shape_cast %112 : vector<512xf32> to vector<1x512xf32>
      %114 = vector.broadcast %113 : vector<1x512xf32> to vector<16x512xf32>
      %115 = arith.mulf %110, %114 : vector<16x512xf32>
      %116 = arith.addf %109, %115 : vector<16x512xf32>
      %c32_i32_71 = arith.constant 32 : i32
      %117 = tpu.dynamic_rotate %110 by %c32_i32_71 dim 1 : vector<16x512xf32>, i32 -> vector<16x512xf32>
      %c1_72 = arith.constant 1 : index
      %c0_73 = arith.constant 0 : index
      %c0_74 = arith.constant 0 : index
      %118 = vector.load %arg5[%c1_72, %c0_73, %c0_74] : memref<3x3x512xf32, #tpu.memory_space<vmem>>, vector<1x1x512xf32>
      %119 = vector.shape_cast %118 : vector<1x1x512xf32> to vector<512xf32>
      %120 = vector.shape_cast %119 : vector<512xf32> to vector<1x512xf32>
      %121 = vector.broadcast %120 : vector<1x512xf32> to vector<16x512xf32>
      %122 = arith.mulf %117, %121 : vector<16x512xf32>
      %123 = arith.addf %116, %122 : vector<16x512xf32>
      %c480_i32_75 = arith.constant 480 : i32
      %124 = tpu.dynamic_rotate %110 by %c480_i32_75 dim 1 : vector<16x512xf32>, i32 -> vector<16x512xf32>
      %c1_76 = arith.constant 1 : index
      %c2_77 = arith.constant 2 : index
      %c0_78 = arith.constant 0 : index
      %125 = vector.load %arg5[%c1_76, %c2_77, %c0_78] : memref<3x3x512xf32, #tpu.memory_space<vmem>>, vector<1x1x512xf32>
      %126 = vector.shape_cast %125 : vector<1x1x512xf32> to vector<512xf32>
      %127 = vector.shape_cast %126 : vector<512xf32> to vector<1x512xf32>
      %128 = vector.broadcast %127 : vector<1x512xf32> to vector<16x512xf32>
      %129 = arith.mulf %124, %128 : vector<16x512xf32>
      %130 = arith.addf %123, %129 : vector<16x512xf32>
      %c2_79 = arith.constant 2 : index
      %c0_80 = arith.constant 0 : index
      %131 = vector.load %arg10[%c2_79, %c0_80] : memref<18x512xf32, #tpu.memory_space<vmem>>, vector<16x512xf32>
      %c2_81 = arith.constant 2 : index
      %c1_82 = arith.constant 1 : index
      %c0_83 = arith.constant 0 : index
      %132 = vector.load %arg5[%c2_81, %c1_82, %c0_83] : memref<3x3x512xf32, #tpu.memory_space<vmem>>, vector<1x1x512xf32>
      %133 = vector.shape_cast %132 : vector<1x1x512xf32> to vector<512xf32>
      %134 = vector.shape_cast %133 : vector<512xf32> to vector<1x512xf32>
      %135 = vector.broadcast %134 : vector<1x512xf32> to vector<16x512xf32>
      %136 = arith.mulf %131, %135 : vector<16x512xf32>
      %137 = arith.addf %130, %136 : vector<16x512xf32>
      %c32_i32_84 = arith.constant 32 : i32
      %138 = tpu.dynamic_rotate %131 by %c32_i32_84 dim 1 : vector<16x512xf32>, i32 -> vector<16x512xf32>
      %c2_85 = arith.constant 2 : index
      %c0_86 = arith.constant 0 : index
      %c0_87 = arith.constant 0 : index
      %139 = vector.load %arg5[%c2_85, %c0_86, %c0_87] : memref<3x3x512xf32, #tpu.memory_space<vmem>>, vector<1x1x512xf32>
      %140 = vector.shape_cast %139 : vector<1x1x512xf32> to vector<512xf32>
      %141 = vector.shape_cast %140 : vector<512xf32> to vector<1x512xf32>
      %142 = vector.broadcast %141 : vector<1x512xf32> to vector<16x512xf32>
      %143 = arith.mulf %138, %142 : vector<16x512xf32>
      %144 = arith.addf %137, %143 : vector<16x512xf32>
      %c480_i32_88 = arith.constant 480 : i32
      %145 = tpu.dynamic_rotate %131 by %c480_i32_88 dim 1 : vector<16x512xf32>, i32 -> vector<16x512xf32>
      %c2_89 = arith.constant 2 : index
      %c2_90 = arith.constant 2 : index
      %c0_91 = arith.constant 0 : index
      %146 = vector.load %arg5[%c2_89, %c2_90, %c0_91] : memref<3x3x512xf32, #tpu.memory_space<vmem>>, vector<1x1x512xf32>
      %147 = vector.shape_cast %146 : vector<1x1x512xf32> to vector<512xf32>
      %148 = vector.shape_cast %147 : vector<512xf32> to vector<1x512xf32>
      %149 = vector.broadcast %148 : vector<1x512xf32> to vector<16x512xf32>
      %150 = arith.mulf %145, %149 : vector<16x512xf32>
      %151 = arith.addf %144, %150 : vector<16x512xf32>
      %c0_92 = arith.constant 0 : index
      %c0_93 = arith.constant 0 : index
      %152 = vector.load %arg6[%c0_92, %c0_93] : memref<1x512xf32, #tpu.memory_space<vmem>>, vector<1x512xf32>
      %153 = vector.broadcast %152 : vector<1x512xf32> to vector<16x512xf32>
      %154 = arith.addf %151, %153 : vector<16x512xf32>
      %c0_94 = arith.constant 0 : index
      %c0_95 = arith.constant 0 : index
      %155 = vector.load %arg7[%c0_94, %c0_95] : memref<128x128xbf16, #tpu.memory_space<vmem>>, vector<128x128xbf16>
      %156 = vector.extract_strided_slice %154 {offsets = [0, 0], sizes = [16, 128], strides = [1, 1]} : vector<16x512xf32> to vector<16x128xf32>
      %157 = arith.truncf %156 : vector<16x128xf32> to vector<16x128xbf16>
      %cst_96 = arith.constant dense<0.000000e+00> : vector<16x128xf32>
      %158 = tpu.matmul %157, %155, %cst_96 {dimension_numbers = #tpu.dot_dimension_numbers<[1], [0], [0], [1], [0, 0, 1, 1], [], []>} : vector<16x128xbf16>, vector<128x128xbf16>, vector<16x128xf32> -> vector<16x128xf32>
      %159 = vector.extract_strided_slice %154 {offsets = [0, 128], sizes = [16, 128], strides = [1, 1]} : vector<16x512xf32> to vector<16x128xf32>
      %160 = arith.truncf %159 : vector<16x128xf32> to vector<16x128xbf16>
      %cst_97 = arith.constant dense<0.000000e+00> : vector<16x128xf32>
      %161 = tpu.matmul %160, %155, %cst_97 {dimension_numbers = #tpu.dot_dimension_numbers<[1], [0], [0], [1], [0, 0, 1, 1], [], []>} : vector<16x128xbf16>, vector<128x128xbf16>, vector<16x128xf32> -> vector<16x128xf32>
      %162 = vector.extract_strided_slice %154 {offsets = [0, 256], sizes = [16, 128], strides = [1, 1]} : vector<16x512xf32> to vector<16x128xf32>
      %163 = arith.truncf %162 : vector<16x128xf32> to vector<16x128xbf16>
      %cst_98 = arith.constant dense<0.000000e+00> : vector<16x128xf32>
      %164 = tpu.matmul %163, %155, %cst_98 {dimension_numbers = #tpu.dot_dimension_numbers<[1], [0], [0], [1], [0, 0, 1, 1], [], []>} : vector<16x128xbf16>, vector<128x128xbf16>, vector<16x128xf32> -> vector<16x128xf32>
      %165 = vector.extract_strided_slice %154 {offsets = [0, 384], sizes = [16, 128], strides = [1, 1]} : vector<16x512xf32> to vector<16x128xf32>
      %166 = arith.truncf %165 : vector<16x128xf32> to vector<16x128xbf16>
      %cst_99 = arith.constant dense<0.000000e+00> : vector<16x128xf32>
      %167 = tpu.matmul %166, %155, %cst_99 {dimension_numbers = #tpu.dot_dimension_numbers<[1], [0], [0], [1], [0, 0, 1, 1], [], []>} : vector<16x128xbf16>, vector<128x128xbf16>, vector<16x128xf32> -> vector<16x128xf32>
      %168 = tpu.concatenate %158, %161, %164, %167 in 1 : vector<16x128xf32>, vector<16x128xf32>, vector<16x128xf32>, vector<16x128xf32> -> vector<16x512xf32>
      %c0_100 = arith.constant 0 : index
      %c0_101 = arith.constant 0 : index
      %169 = vector.load %arg8[%c0_100, %c0_101] : memref<1x512xf32, #tpu.memory_space<vmem>>, vector<1x512xf32>
      %170 = vector.broadcast %169 : vector<1x512xf32> to vector<16x512xf32>
      %171 = arith.addf %168, %170 : vector<16x512xf32>
      %172 = arith.index_cast %arg11 : i32 to index
      %c0_102 = arith.constant 0 : index
      %c0_103 = arith.constant 0 : index
      %173 = vector.load %arg1[%172, %c0_102, %c0_103] : memref<2x16x512xf32, #tpu.memory_space<vmem>>, vector<1x16x512xf32>
      %174 = vector.shape_cast %173 : vector<1x16x512xf32> to vector<16x512xf32>
      %175 = arith.addf %171, %174 : vector<16x512xf32>
      %cst_104 = arith.constant 0.000000e+00 : f32
      %176 = vector.broadcast %cst_104 : f32 to vector<16x512xf32>
      %177 = arith.maximumf %175, %176 : vector<16x512xf32>
      %178 = arith.index_cast %arg11 : i32 to index
      %c0_105 = arith.constant 0 : index
      %c0_106 = arith.constant 0 : index
      %179 = vector.load %arg9[%178, %c0_105, %c0_106] : memref<2x16x512xf32, #tpu.memory_space<vmem>>, vector<1x16x512xf32>
      %180 = vector.shape_cast %179 : vector<1x16x512xf32> to vector<16x512xf32>
      %181 = vector.shape_cast %177 : vector<16x512xf32> to vector<1x16x512xf32>
      tpu.vector_store %arg9[%178, %c0_105, %c0_106], %181 {strides = array<i32>} : memref<2x16x512xf32, #tpu.memory_space<vmem>>, vector<1x16x512xf32>,
    }
    %c2_i32_2 = arith.constant 2 : i32
    return
  }
  func.func @transform_0(%arg0: i32) -> (i32, i32, i32) {
    %c0_i32 = arith.constant 0 : i32
    %c0_i32_0 = arith.constant 0 : i32
    %c0_i32_1 = arith.constant 0 : i32
    return %arg0, %c0_i32, %c0_i32_0 : i32, i32, i32
  }
  func.func @transform_1(%arg0: i32) -> (i32, i32, i32) {
    %c0_i32 = arith.constant 0 : i32
    %c0_i32_0 = arith.constant 0 : i32
    %c0_i32_1 = arith.constant 0 : i32
    %c0_i32_2 = arith.constant 0 : i32
    return %c0_i32, %c0_i32_0, %c0_i32_1 : i32, i32, i32
  }
  func.func @transform_2(%arg0: i32) -> (i32, i32) {
    %c0_i32 = arith.constant 0 : i32
    %c0_i32_0 = arith.constant 0 : i32
    %c0_i32_1 = arith.constant 0 : i32
    return %c0_i32, %c0_i32_0 : i32, i32
  }
  func.func @transform_3(%arg0: i32) -> (i32, i32) {
    %c0_i32 = arith.constant 0 : i32
    %c0_i32_0 = arith.constant 0 : i32
    %c0_i32_1 = arith.constant 0 : i32
    return %c0_i32, %c0_i32_0 : i32, i32
  }
  func.func @transform_4(%arg0: i32) -> (i32, i32, i32) {
    %c0_i32 = arith.constant 0 : i32
    %c0_i32_0 = arith.constant 0 : i32
    %c0_i32_1 = arith.constant 0 : i32
    %c0_i32_2 = arith.constant 0 : i32
    return %c0_i32, %c0_i32_0, %c0_i32_1 : i32, i32, i32
  }
  func.func @transform_5(%arg0: i32) -> (i32, i32) {
    %c0_i32 = arith.constant 0 : i32
    %c0_i32_0 = arith.constant 0 : i32
    %c0_i32_1 = arith.constant 0 : i32
    return %c0_i32, %c0_i32_0 : i32, i32
  }
  func.func @transform_6(%arg0: i32) -> (i32, i32) {
    %c0_i32 = arith.constant 0 : i32
    %c0_i32_0 = arith.constant 0 : i32
    %c0_i32_1 = arith.constant 0 : i32
    return %c0_i32, %c0_i32_0 : i32, i32
  }
  func.func @transform_7(%arg0: i32) -> (i32, i32) {
    %c0_i32 = arith.constant 0 : i32
    %c0_i32_0 = arith.constant 0 : i32
    %c0_i32_1 = arith.constant 0 : i32
    return %c0_i32, %c0_i32_0 : i32, i32
  }
  func.func @transform_8(%arg0: i32) -> (i32, i32, i32) {
    %c0_i32 = arith.constant 0 : i32
    %c0_i32_0 = arith.constant 0 : i32
    %c0_i32_1 = arith.constant 0 : i32
    return %arg0, %c0_i32, %c0_i32_0 : i32, i32, i32
  }
}

</mosaic_0001>

<bundles_post_ra>
// kernel: tile.26
= control target key start
LH: loop header
LB: loop body
LE: loop exit
PB: predicated region body
PF: predicated region fallthrough
CT: control target
= control target key end

     0   :  { %vm38_vm0 = vcmask 1043458   ;;  %vm43_vm1 = vcmask 1045508   ;;  %s86_s6 = smov 3  ;;  %vm48_vm2 = vcmask 1047558   ;;  %s89_s9 = smov 12  ;;  %vm3_vm3 = vcmask 261120   ;;  %s891_s0 = inlined_call_operand.vmem [shape: f32[3,3,16,32], index: 0, kind: input, shape index: {}]   ;;  %s892_s1 = inlined_call_operand.vmem [shape: f32[3,3,512], index: 1, kind: output, shape index: {}]  }
   0x1   :  { %v497_v0 = vld [vmem:[%s891_s0 + $0x63] ss:$16 sm:%s86_s6]   ;;  %s94_s10 = smov 48  ;;  %s99_s15 = smov 192  ;;  %v487_v15 = vld [vmem:[%s891_s0 + $0x60] ss:$4 sm:$0xff]  }
   0x2   :  { %v498_v1 = vld [vmem:[%s891_s0 + $0xbb] ss:$-28 sm:%s89_s9]   ;;  %s33_s16 = smov 3  ;;  %s36_s21 = smov 12  ;;  %v2_v22 = vld [vmem:[%s891_s0] ss:$4 sm:$0xff]  }
   0x3   :  { %v499_v2 = vld [vmem:[%s891_s0 + $0x37] ss:$16 sm:%s94_s10]   ;;  %v92_v3 = vsel %vm38_vm0, %v498_v1, %v497_v0  ;;  %v500_v4 = vld [vmem:[%s891_s0 + $0xb] ss:$16 sm:%s99_s15]   ;;  %s41_s22 = smov 48  ;;  %s46_s27 = smov 192 }
   0x4   :  { %v489_v5 = vld [vmem:[%s891_s0 + $0x3] ss:$16 sm:%s33_s16]   ;;  %v97_v6 = vsel %vm43_vm1, %v499_v2, %v92_v3  ;;  %v491_v8 = vld [vmem:[%s891_s0 - $0x29] ss:$16 sm:%s41_s22]   ;;  %s113_s28 = smov 3  ;;  %s116_s4 = smov 12 }
   0x5   :  { %v490_v7 = vld [vmem:[%s891_s0 + $0x5b] ss:$-28 sm:%s36_s21]   ;;  %v102_v9 = vsel %vm48_vm2, %v500_v4, %v97_v6  ;;  %s121_s5 = smov 48  ;;  %s557_s6 = smov 96   ;;  %v485_v28 = vld [vmem:[%s891_s0 + $0x20] ss:$4 sm:$0xff]  }
   0x6   :  { %v39_v10 = vsel %vm38_vm0, %v490_v7, %v489_v5  ;;  %v492_v11 = vld [vmem:[%s891_s0 - $0x55] ss:$16 sm:%s46_s27]   ;;  %103 = vrot.lane.b32.xlu1 %v102_v9, %s557_s6  ;;  %s126_s9 = smov 192  ;;  %s59_s10 = smov 3  ;;  %v486_v38 = vld [vmem:[%s891_s0 + $0x40] ss:$4 sm:$0xff]  }
   0x7   :  { %v501_v12 = vld [vmem:[%s891_s0 + $0x2b] ss:$-28 sm:%s113_s28]   ;;  %v44_v13 = vsel %vm43_vm1, %v491_v8, %v39_v10  ;;  %s62_s17 = smov 12  ;;  %s67_s18 = smov 48  ;;  %vm52_vm4 = vcmask 1048320   ;;  %vm176_vm5 = vcmask 785920  }
   0x8   :  { %v502_v14 = vld [vmem:[%s891_s0 - $0x1] ss:$16 sm:%s116_s4]   ;;  %v49_v16 = vsel %vm48_vm2, %v492_v11, %v44_v13  ;;  %24 = vst.msk [vmem:[#allocation0 + $0x40] ss:$8 sm:$0xf] %vm3_vm3, %v487_v15   ;;  %s72_s21 = smov 192 }
   0x9   :  { %v119_v17 = vsel %vm38_vm0, %v502_v14, %v501_v12  ;;  %v503_v18 = vld [vmem:[%s891_s0 + $0xcb] ss:$-28 sm:%s121_s5]   ;;  %26 = vst.msk [vmem:[#allocation0 + $0x21] ss:$8 sm:$0xf0] %vm3_vm3, %v487_v15   ;;  %50 = vrot.lane.b32.xlu0 %v49_v16, %s557_s6  ;;  %s157_s22 = smov 3 }
   0xa   :  { %v504_v19 = vld [vmem:[%s891_s0 - $0x11] ss:$16 sm:%s126_s9]   ;;  %v124_v20 = vsel %vm43_vm1, %v503_v18, %v119_v17  ;;  %v493_v21 = vld [vmem:[%s891_s0 + $0x33] ss:$16 sm:%s59_s10]   ;;  %s160_s29 = smov 12  ;;  %s165_s30 = smov 48 }
   0xb   :  { %v129_v23 = vsel %vm48_vm2, %v504_v19, %v124_v20  ;;  %v494_v24 = vld [vmem:[%s891_s0 + $0x8b] ss:$-28 sm:%s62_s17]   ;;  %4 = vst.msk [vmem:[#allocation0] ss:$8 sm:$0xf] %vm3_vm3, %v2_v22   ;;  %s170_s4 = smov 192 }
   0xc   :  { %v495_v25 = vld [vmem:[%s891_s0 + $0x7] ss:$16 sm:%s67_s18]   ;;  %6 = vst.msk [vmem:[#allocation0 - $0x1f] ss:$8 sm:$0xf0] %vm3_vm3, %v2_v22   ;;  %130 = vrot.lane.b32.xlu1 %v129_v23, %s557_s6  ;;  %v65_v26 = vsel %vm38_vm0, %v494_v24, %v493_v21  ;;  %s142_s12 = smov 3 }
   0xd   :  { %v496_v27 = vld [vmem:[%s891_s0 - $0x25] ss:$16 sm:%s72_s21]   ;;  %v70_v29 = vsel %vm43_vm1, %v495_v25, %v65_v26  ;;  %v507_v30 = vld [vmem:[%s891_s0 + $0x2] ss:$16 sm:%s157_s22]   ;;  %s145_s13 = smov 12  ;;  %s210_s18 = smov 3 }
   0xe   :  { %v508_v31 = vld [vmem:[%s891_s0 + $0x5a] ss:$-28 sm:%s160_s29]   ;;  %11 = vst.msk [vmem:[#allocation0 + $0x2] ss:$8 sm:$0xf] %vm3_vm3, %v485_v28   ;;  %v75_v32 = vsel %vm48_vm2, %v496_v27, %v70_v29  ;;  %s213_s19 = smov 12 }
   0xf   :  { %12 = vst.msk [vmem:[#allocation0] ss:$8 sm:$0xf0] %vm3_vm3, %v485_v28   ;;  %v163_v33 = vsel %vm38_vm0, %v508_v31, %v507_v30  ;;  %v509_v34 = vld [vmem:[%s891_s0 - $0x2a] ss:$16 sm:%s165_s30]   ;;  %76 = vrot.lane.b32.xlu0 %v75_v32, %s557_s6  ;;  %s218_s22 = smov 48 }
  0x10   :  { %v510_v35 = vld [vmem:[%s891_s0 - $0x56] ss:$16 sm:%s170_s4]   ;;  %v168_v36 = vsel %vm43_vm1, %v509_v34, %v163_v33  ;;  %v505_v37 = vld [vmem:[%s891_s0 + $0x8b] ss:$-28 sm:%s142_s12]   ;;  %s223_s23 = smov 192  ;;  %s183_s30 = smov 3 }
  0x11   :  { %v173_v39 = vsel %vm48_vm2, %v510_v35, %v168_v36  ;;  %v506_v40 = vld [vmem:[%s891_s0 + $0x5f] ss:$16 sm:%s145_s13]   ;;  %v515_v41 = vld [vmem:[%s891_s0 + $0x62] ss:$16 sm:%s210_s18]   ;;  %s558_s2 = smov 64   ;;  %s186_s5 = smov 12 }
  0x12   :  { %17 = vst.msk [vmem:[#allocation0 + $0x21] ss:$8 sm:$0xf] %vm3_vm3, %v486_v38   ;;  %19 = vst.msk [vmem:[#allocation0 + $0x2] ss:$8 sm:$0xf0] %vm3_vm3, %v486_v38   ;;  %174 = vrot.lane.b32.xlu1 %v173_v39, %s558_s2  ;;  %v148_v42 = vsel %vm38_vm0, %v506_v40, %v505_v37 }
  0x13   :  { %v516_v43 = vld [vmem:[%s891_s0 + $0xba] ss:$-28 sm:%s213_s19]   ;;  %s191_s7 = smov 48  ;;  %s196_s12 = smov 192  ;;  %149 = vrot.lane.b32.xlu0 %v148_v42, %s557_s6  ;;  %vm300_vm6 = vcmask 523520  }
  0x14   :  { %v216_v44 = vsel %vm38_vm0, %v516_v43, %v515_v41  ;;  %v517_v45 = vld [vmem:[%s891_s0 + $0x36] ss:$16 sm:%s218_s22]   ;;  %v518_v46 = vld [vmem:[%s891_s0 + $0xa] ss:$16 sm:%s223_s23]   ;;  %s266_s14 = smov 3  ;;  %s269_s15 = smov 12 }
  0x15   :  { %v221_v47 = vsel %vm43_vm1, %v517_v45, %v216_v44  ;;  %v511_v48 = vld [vmem:[%s891_s0 + $0x32] ss:$16 sm:%s183_s30]   ;;  %v513_v51 = vld [vmem:[%s891_s0 + $0x6] ss:$16 sm:%s191_s7]   ;;  %s237_s20 = smov 3  ;;  %s240_s21 = smov 12 }
  0x16   :  { %v226_v49 = vsel %vm48_vm2, %v518_v46, %v221_v47  ;;  %v512_v50 = vld [vmem:[%s891_s0 + $0x8a] ss:$-28 sm:%s186_s5]   ;;  %s245_s24 = smov 48  ;;  %s250_s29 = smov 192 }
  0x17   :  { %227 = vrot.lane.b32.xlu1 %v226_v49, %s558_s2  ;;  %v189_v52 = vsel %vm38_vm0, %v512_v50, %v511_v48  ;;  %v514_v53 = vld [vmem:[%s891_s0 - $0x26] ss:$16 sm:%s196_s12]   ;;  %s307_s7 = smov 3  ;;  %s310_s8 = smov 12 }
  0x18   :  { %v194_v54 = vsel %vm43_vm1, %v513_v51, %v189_v52  ;;  %v523_v55 = vld [vmem:[%s891_s0 + $0x8a] ss:$-28 sm:%s266_s14]   ;;  %s315_s11 = smov 48  ;;  %s320_s12 = smov 192  ;;  %v529_v2 = vld [vmem:[%s891_s0 + $0x31] ss:$16 sm:%s307_s7]  }
  0x19   :  { %v524_v56 = vld [vmem:[%s891_s0 + $0x5e] ss:$16 sm:%s269_s15]   ;;  %v199_v57 = vsel %vm48_vm2, %v514_v53, %v194_v54  ;;  %s281_s14 = smov 3  ;;  %v530_v3 = vld [vmem:[%s891_s0 + $0x89] ss:$-28 sm:%s310_s8]   ;;  %s284_s19 = smov 12 }
  0x1a   :  { %v272_v58 = vsel %vm38_vm0, %v524_v56, %v523_v55  ;;  %v519_v59 = vld [vmem:[%s891_s0 + $0x2a] ss:$-28 sm:%s237_s20]   ;;  %200 = vrot.lane.b32.xlu0 %v199_v57, %s558_s2  ;;  %s289_s20 = smov 48  ;;  %v313_v4 = vsel %vm38_vm0, %v530_v3, %v529_v2  ;;  %s294_s25 = smov 192 }
  0x1b   :  { %v520_v60 = vld [vmem:[%s891_s0 - $0x2] ss:$16 sm:%s240_s21]   ;;  %273 = vrot.lane.b32.xlu1 %v272_v58, %s558_s2  ;;  %s361_s27 = smov 3  ;;  %s364_s28 = smov 12 }
  0x1c   :  { %v243_v61 = vsel %vm38_vm0, %v520_v60, %v519_v59  ;;  %v521_v62 = vld [vmem:[%s891_s0 + $0xca] ss:$-28 sm:%s245_s24]   ;;  %v531_v5 = vld [vmem:[%s891_s0 + $0x5] ss:$16 sm:%s315_s11]   ;;  %s369_s5 = smov 48  ;;  %s374_s7 = smov 192 }
  0x1d   :  { %v248_v63 = vsel %vm43_vm1, %v521_v62, %v243_v61  ;;  %v522_v0 = vld [vmem:[%s891_s0 - $0x12] ss:$16 sm:%s250_s29]   ;;  %v532_v6 = vld [vmem:[%s891_s0 - $0x27] ss:$16 sm:%s320_s12]   ;;  %v318_v7 = vsel %vm43_vm1, %v531_v5, %v313_v4  ;;  %s559_s8 = smov 32   ;;  %s334_s11 = smov 3 }
  0x1e   :  { %v253_v1 = vsel %vm48_vm2, %v522_v0, %v248_v63  ;;  %v525_v8 = vld [vmem:[%s891_s0 + $0x1] ss:$16 sm:%s281_s14]   ;;  %v323_v9 = vsel %vm48_vm2, %v532_v6, %v318_v7  ;;  %v527_v11 = vld [vmem:[%s891_s0 - $0x2b] ss:$16 sm:%s289_s20]   ;;  %s337_s17 = smov 12  ;;  %s342_s18 = smov 48 }
  0x1f   :  { %254 = vrot.lane.b32.xlu0 %v253_v1, %s558_s2  ;;  %v526_v10 = vld [vmem:[%s891_s0 + $0x59] ss:$-28 sm:%s284_s19]   ;;  %324 = vrot.lane.b32.xlu1 %v323_v9, %s559_s8  ;;  %s347_s23 = smov 192  ;;  %s390_s2 = smov 3 }
  0x20   :  { %v287_v12 = vsel %vm38_vm0, %v526_v10, %v525_v8  ;;  %v528_v13 = vld [vmem:[%s891_s0 - $0x57] ss:$16 sm:%s294_s25]   ;;  %v488_v14 = vld [vmem:[%s891_s0 + $0x80] ss:$4 sm:$0xf]   ;;  %s393_s26 = smov 12 }
  0x21   :  { %v292_v15 = vsel %vm43_vm1, %v527_v11, %v287_v12  ;;  %v537_v16 = vld [vmem:[%s891_s0 + $0x29] ss:$-28 sm:%s361_s27]   ;;  %31 = vst.msk [vmem:[#allocation0 + $0x42] ss:$8 sm:$0xf] %vm3_vm3, %v488_v14  }
  0x22   :  { %v538_v17 = vld [vmem:[%s891_s0 - $0x3] ss:$16 sm:%s364_s28]   ;;  %v297_v18 = vsel %vm48_vm2, %v528_v13, %v292_v15  ;;  %v533_v23 = vld [vmem:[%s891_s0 + $0x61] ss:$16 sm:%s334_s11]  }
  0x23   :  { %v367_v19 = vsel %vm38_vm0, %v538_v17, %v537_v16  ;;  %v539_v20 = vld [vmem:[%s891_s0 + $0xc9] ss:$-28 sm:%s369_s5]   ;;  %298 = vrot.lane.b32.xlu0 %v297_v18, %s559_s8 }
  0x24   :  { %v540_v21 = vld [vmem:[%s891_s0 - $0x13] ss:$16 sm:%s374_s7]   ;;  %v372_v22 = vsel %vm43_vm1, %v539_v20, %v367_v19  ;;  %v535_v26 = vld [vmem:[%s891_s0 + $0x35] ss:$16 sm:%s342_s18]  }
  0x25   :  { %v377_v24 = vsel %vm48_vm2, %v540_v21, %v372_v22  ;;  %v534_v25 = vld [vmem:[%s891_s0 + $0xb9] ss:$-28 sm:%s337_s17]  }
  0x26   :  { %378 = vrot.lane.b32.xlu1 %v377_v24, %s559_s8  ;;  %v340_v27 = vsel %vm38_vm0, %v534_v25, %v533_v23  ;;  %v536_v28 = vld [vmem:[%s891_s0 + $0x9] ss:$16 sm:%s347_s23]  }
  0x27   :  { %v345_v29 = vsel %vm43_vm1, %v535_v26, %v340_v27  ;;  %v541_v30 = vld [vmem:[%s891_s0 + $0x89] ss:$-28 sm:%s390_s2]  }
  0x28   :  { %v542_v31 = vld [vmem:[%s891_s0 + $0x5d] ss:$16 sm:%s393_s26]   ;;  %v350_v32 = vsel %vm48_vm2, %v536_v28, %v345_v29 }
  0x29   :  { %351 = vrot.lane.b32.xlu0 %v350_v32, %s559_s8  ;;  %v396_v33 = vsel %vm38_vm0, %v542_v31, %v541_v30 }
  0x2d   :  { %397 = vrot.lane.b32.xlu0 %v396_v33, %s559_s8 }
  0x78   :  { %v104_v34 = vpop.permute.xlu1 %103  }
  0x79   :  { %107 = vst.msk [vmem:[#allocation0 + $0x40] sm:$0x7] %vm52_vm4, %v104_v34   ;;  %109 = vst.msk [vmem:[#allocation0 + $0x45] sm:$0x38] %vm52_vm4, %v104_v34  }
  0x7a   :  { %111 = vst.msk [vmem:[#allocation0 + $0x4a] sm:$0xc0] %vm52_vm4, %v104_v34  }
  0x7b   :  { %v51_v35 = vpop.permute.xlu0 %50  }
  0x7c   :  { %53 = vst.msk [vmem:[#allocation0] sm:$0x7] %vm52_vm4, %v51_v35   ;;  %55 = vst.msk [vmem:[#allocation0 + $0x5] sm:$0x38] %vm52_vm4, %v51_v35  }
  0x7d   :  { %57 = vst.msk [vmem:[#allocation0 + $0xa] sm:$0xc0] %vm52_vm4, %v51_v35  }
  0x7e   :  { %v131_v36 = vpop.permute.xlu1 %130  }
  0x7f   :  { %134 = vst.msk [vmem:[#allocation0 + $0x12] ss:$6 sm:$0x3] %vm52_vm4, %v131_v36   ;;  %136 = vst.msk [vmem:[#allocation0 + $0x17] sm:$0xc] %vm52_vm4, %v131_v36  }
  0x80   :  { %138 = vst.msk [vmem:[#allocation0 + $0x1a] ss:$6 sm:$0x30] %vm52_vm4, %v131_v36   ;;  %140 = vst.msk [vmem:[#allocation0 + $0x33] sm:$0xc0] %vm52_vm4, %v131_v36  }
  0x81   :  { %v77_v37 = vpop.permute.xlu0 %76  }
  0x82   :  { %80 = vst.msk [vmem:[#allocation0 + $0x20] sm:$0x7] %vm52_vm4, %v77_v37   ;;  %82 = vst.msk [vmem:[#allocation0 + $0x25] sm:$0x38] %vm52_vm4, %v77_v37  }
  0x83   :  { %84 = vst.msk [vmem:[#allocation0 + $0x2a] sm:$0xc0] %vm52_vm4, %v77_v37  }
  0x84   :  { %v175_v38 = vpop.permute.xlu1 %174  }
  0x85   :  { %177 = vst.msk [vmem:[#allocation0] sm:$0x7] %vm176_vm5, %v175_v38   ;;  %179 = vst.msk [vmem:[#allocation0 + $0x5] sm:$0x38] %vm176_vm5, %v175_v38   ;;  %v150_v39 = vpop.permute.xlu0 %149  }
  0x86   :  { %181 = vst.msk [vmem:[#allocation0 + $0xa] sm:$0xc0] %vm176_vm5, %v175_v38  }
  0x87   :  { %153 = vst.msk [vmem:[#allocation0 + $0x52] ss:$6 sm:$0x3] %vm52_vm4, %v150_v39   ;;  %155 = vst.msk [vmem:[#allocation0 + $0x57] sm:$0xc] %vm52_vm4, %v150_v39  }
  0x89   :  { %v228_v40 = vpop.permute.xlu1 %227  }
  0x8a   :  { %231 = vst.msk [vmem:[#allocation0 + $0x40] sm:$0x7] %vm176_vm5, %v228_v40   ;;  %233 = vst.msk [vmem:[#allocation0 + $0x45] sm:$0x38] %vm176_vm5, %v228_v40  }
  0x8b   :  { %235 = vst.msk [vmem:[#allocation0 + $0x4a] sm:$0xc0] %vm176_vm5, %v228_v40  }
  0x8c   :  { %v201_v41 = vpop.permute.xlu0 %200  }
  0x8d   :  { %204 = vst.msk [vmem:[#allocation0 + $0x20] sm:$0x7] %vm176_vm5, %v201_v41   ;;  %206 = vst.msk [vmem:[#allocation0 + $0x25] sm:$0x38] %vm176_vm5, %v201_v41   ;;  %v274_v42 = vpop.permute.xlu1 %273  }
  0x8e   :  { %208 = vst.msk [vmem:[#allocation0 + $0x2a] sm:$0xc0] %vm176_vm5, %v201_v41   ;;  %277 = vst.msk [vmem:[#allocation0 + $0x52] ss:$6 sm:$0x3] %vm176_vm5, %v274_v42  }
  0x8f   :  { %279 = vst.msk [vmem:[#allocation0 + $0x57] sm:$0xc] %vm176_vm5, %v274_v42  }
  0x91   :  { %v255_v43 = vpop.permute.xlu0 %254   ;;  %v325_v44 = vpop.permute.xlu1 %324  }
  0x92   :  { %258 = vst.msk [vmem:[#allocation0 + $0x12] ss:$6 sm:$0x3] %vm176_vm5, %v255_v43   ;;  %260 = vst.msk [vmem:[#allocation0 + $0x17] sm:$0xc] %vm176_vm5, %v255_v43  }
  0x93   :  { %262 = vst.msk [vmem:[#allocation0 + $0x1a] ss:$6 sm:$0x30] %vm176_vm5, %v255_v43   ;;  %264 = vst.msk [vmem:[#allocation0 + $0x33] sm:$0xc0] %vm176_vm5, %v255_v43  }
  0x94   :  { %328 = vst.msk [vmem:[#allocation0 + $0x20] sm:$0x7] %vm300_vm6, %v325_v44   ;;  %330 = vst.msk [vmem:[#allocation0 + $0x25] sm:$0x38] %vm300_vm6, %v325_v44  }
  0x95   :  { %332 = vst.msk [vmem:[#allocation0 + $0x2a] sm:$0xc0] %vm300_vm6, %v325_v44   ;;  %v299_v45 = vpop.permute.xlu0 %298  }
  0x96   :  { %301 = vst.msk [vmem:[#allocation0] sm:$0x7] %vm300_vm6, %v299_v45   ;;  %303 = vst.msk [vmem:[#allocation0 + $0x5] sm:$0x38] %vm300_vm6, %v299_v45  }
  0x97   :  { %305 = vst.msk [vmem:[#allocation0 + $0xa] sm:$0xc0] %vm300_vm6, %v299_v45  }
  0x98   :  { %v379_v46 = vpop.permute.xlu1 %378  }
  0x99   :  { %382 = vst.msk [vmem:[#allocation0 + $0x12] ss:$6 sm:$0x3] %vm300_vm6, %v379_v46   ;;  %384 = vst.msk [vmem:[#allocation0 + $0x17] sm:$0xc] %vm300_vm6, %v379_v46  }
  0x9a   :  { %386 = vst.msk [vmem:[#allocation0 + $0x1a] ss:$6 sm:$0x30] %vm300_vm6, %v379_v46   ;;  %388 = vst.msk [vmem:[#allocation0 + $0x33] sm:$0xc0] %vm300_vm6, %v379_v46  }
  0x9b   :  { %v428_v47 = vld [vmem:[#allocation0 + $0x20] sm:$0xf]  ;;  %v434_v48 = vld [vmem:[#allocation0 + $0x28] sm:$0xf]  ;;  %v352_v49 = vpop.permute.xlu0 %351  }
  0x9c   :  { %546 = vst [vmem:[%s892_s1 + $0x10] sm:$0xf] %v428_v47  ;;  %547 = vst [vmem:[%s892_s1 + $0x14] sm:$0xf] %v434_v48 }
  0x9d   :  { %355 = vst.msk [vmem:[#allocation0 + $0x40] sm:$0x7] %vm300_vm6, %v352_v49   ;;  %357 = vst.msk [vmem:[#allocation0 + $0x45] sm:$0x38] %vm300_vm6, %v352_v49   ;;  %v407_v50 = vld [vmem:[#allocation0] sm:$0xf] }
  0x9e   :  { %359 = vst.msk [vmem:[#allocation0 + $0x4a] sm:$0xc0] %vm300_vm6, %v352_v49   ;;  %v411_v51 = vld [vmem:[#allocation0 + $0x8] sm:$0xf]  ;;  %409 = vst [vmem:[%s892_s1] sm:$0xf] %v407_v50 }
  0x9f   :  { %543 = vst [vmem:[%s892_s1 + $0x4] sm:$0xf] %v411_v51  ;;  %v398_v52 = vpop.permute.xlu0 %397  }
  0xa0   :  { %v416_v53 = vld [vmem:[#allocation0 + $0x10] sm:$0xf]  ;;  %v422_v54 = vld [vmem:[#allocation0 + $0x18] sm:$0xf]  ;;  %403 = vst.msk [vmem:[#allocation0 + $0x57] sm:$0xc] %vm300_vm6, %v398_v52  }
  0xa1   :  { %v446_v55 = vld [vmem:[#allocation0 + $0x38] sm:$0xf]  ;;  %401 = vst.msk [vmem:[#allocation0 + $0x52] ss:$6 sm:$0x3] %vm300_vm6, %v398_v52  }
  0xa2   :  { %544 = vst [vmem:[%s892_s1 + $0x8] sm:$0xf] %v416_v53  ;;  %545 = vst [vmem:[%s892_s1 + $0xc] sm:$0xf] %v422_v54  ;;  %v440_v56 = vld [vmem:[#allocation0 + $0x30] sm:$0xf] }
  0xa3   :  { %549 = vst [vmem:[%s892_s1 + $0x1c] sm:$0xf] %v446_v55  ;;  %548 = vst [vmem:[%s892_s1 + $0x18] sm:$0xf] %v440_v56 }
  0xa4   :  { %v452_v57 = vld [vmem:[#allocation0 + $0x40] sm:$0xf]  ;;  %v458_v58 = vld [vmem:[#allocation0 + $0x48] sm:$0xf] }
  0xa5   :  { %550 = vst [vmem:[%s892_s1 + $0x20] sm:$0xf] %v452_v57  ;;  %551 = vst [vmem:[%s892_s1 + $0x24] sm:$0xf] %v458_v58 }
  0xa8   :  { %v464_v59 = vld [vmem:[#allocation0 + $0x50] sm:$0xf]  ;;  %v470_v60 = vld [vmem:[#allocation0 + $0x58] sm:$0xf] }
  0xa9   :  { %552 = vst [vmem:[%s892_s1 + $0x28] sm:$0xf] %v464_v59  ;;  %553 = vst [vmem:[%s892_s1 + $0x2c] sm:$0xf] %v470_v60 }

// kernel: depthwise_basic_block.1
= control target key start
LH: loop header
LB: loop body
LE: loop exit
PB: predicated region body
PF: predicated region fallthrough
CT: control target
= control target key end

     0   :  { %s2846_s27 = smov 0   ;;  %s4559_s0 = inlined_call_operand.vmem [shape: f32[8,16,512], index: 0, kind: input, shape index: {}]   ;;  %s4560_s1 = inlined_call_operand.vmem [shape: f32[3,3,512], index: 1, kind: input, shape index: {}]   ;;  %s4561_s2 = inlined_call_operand.vmem [shape: f32[1,512], index: 2, kind: input, shape index: {}]   ;;  %s4562_s3 = inlined_call_operand.vmem [shape: bf16[128,128], index: 3, kind: input, shape index: {}]   ;;  %s4563_s4 = inlined_call_operand.vmem [shape: f32[3,3,512], index: 4, kind: input, shape index: {}]   ;;  %s4564_s5 = inlined_call_operand.vmem [shape: f32[1,512], index: 5, kind: input, shape index: {}]   ;;  %s4565_s6 = inlined_call_operand.vmem [shape: bf16[128,128], index: 6, kind: input, shape index: {}]   ;;  %s4566_s7 = inlined_call_operand.vmem [shape: f32[1,512], index: 7, kind: input, shape index: {}]   ;;  %s4567_s8 = inlined_call_operand.vmem [shape: f32[8,16,512], index: 8, kind: output, shape index: {}]  }
   0x1 LB: > { %s2459_s28 = sadd.s32 4294967295, %s2790_s27   ;;  %p2463_p0 = scmp.ge.s32.totalorder %s2790_s27, 1  ;;  %s2790_s27 = sphi %s2846_s27, %s18_s27  }
   0x2   : > { %p264_p1 = scmp.lt.s32.totalorder %s2790_s27, 5 }
   0x4   : > { %p265_p2 = pnand %p2463_p0, %p264_p1 }
   0x5   : > { %s2464_s29 = sshll.u32 (!%p265_p2), %s2459_s28, 1  ;;  %v4568_v0 = vlaneseq (!%p265_p2)  ;;  %v2796_v1 = vmov (!%p265_p2), 0.0   ;;  %s2865_s15 = smov (!%p265_p2), 0  }
   0x6   : > { %268 = sbr.rel (%p265_p2) target bundleno = 893 (0x37d), region = 52  ;;  %p301_p3 = scmp.lt.s32.totalorder (!%p265_p2), %s2464_s29, 7 }
   0x7   : > { %vm317_vm0 = vcmp.lt.s32.totalorder (!%p265_p2), %v4568_v0, 512 }
   0x8   : > { %319 = vst.msk [vmem:[#allocation2] ss:$8 sm:$0xf] (!%p265_p2), %vm317_vm0, %v2796_v1  ;;  %322 = vst.msk [vmem:[#allocation2 + $0x41] ss:$8 sm:$0xf] (!%p265_p2), %vm317_vm0, %v2796_v1 }
   0xd   : > { %s4808_s29 = smov (!%p301_p3, %s2464_s29), 7 }
   0xe   : > { %s2507_s30 = sshll.u32 %s4808_s29, 6 }
   0xf   : > { %s2858_s11 = scalar_lea.vmem %s4559_s0, %s2507_s30  ;;  %s2863_s14 = scalar_lea.vmem %s4567_s8, %s2507_s30 }
  0x10 LB: >> { %s2509_s16 = sshll.u32 %s2794_s15, 6  ;;  %vm349_vm1 = vcmask 1040384   ;;  %s2797_s18 = smov 32   ;;  %vm614_vm2 = vcmask 1046528   ;;  %v2958_v45 = vld [vmem:[%s4562_s3] sm:$0xff]   ;;  %v4569_v46 = vmov 0.0   ;;  %v4674_v0 = vlaneseq  ;;  %s2794_s15 = sphi %s2865_s15, %s329_s15  }
  0x11   : >> { %s2874_s17 = scalar_lea.vmem %s2858_s11, %s2509_s16  ;;  %s2798_s19 = smov 96   ;;  %4662 = vst [vmem:[#allocation7_spill] sm:$0xff] %v2958_v45  ;;  %2603 = vmatprep.subr.bf16.mxu1 %v4569_v46  ;;  %2583 = vmatprep.subr.bf16.mxu0 %v4569_v46  ;;  %v2980_v51 = vld [vmem:[%s4562_s3 + $0x8] sm:$0xff]   ;;  %v2996_v55 = vld [vmem:[%s4562_s3 + $0x10] sm:$0xff]   ;;  %v3017_v60 = vld [vmem:[%s4562_s3 + $0x18] sm:$0xff]   ;;  %vm872_vm3 = vcmask 1045504  }
  0x12   : >> { %v334_v2 = vld [vmem:[%s2874_s17 + $0x8] sm:$0xff]  ;;  %v333_v3 = vld [vmem:[%s2874_s17] sm:$0xff]  ;;  %v336_v8 = vld [vmem:[%s2874_s17 + $0x18] sm:$0xff]  ;;  %2604 = vmatpush3.bf16.msra.mxu1 %v2958_v45  ;;  %2584 = vmatpush3.bf16.msra.mxu0 %v2958_v45  ;;  %4663 = vst [vmem:[#allocation8_spill] sm:$0xff] %v2980_v51  ;;  %vm2800_vm4 = vmmov 0   ;;  %s4536_s20 = scalar_lea.vmem %s2863_s14, %s2509_s16  ;;  %s329_s15 = sadd.s32 1, %s2794_s15  }
  0x13   : >> { %v338_v4 = vld [vmem:[%s2874_s17 + $0x28] sm:$0xff]  ;;  %v351_v5 = vrot.slane %v334_v2, 7  ;;  %v350_v6 = vrot.slane %v333_v3, 7  ;;  %v340_v9 = vld [vmem:[%s2874_s17 + $0x38] sm:$0xff]  ;;  %v335_v10 = vld [vmem:[%s2874_s17 + $0x10] sm:$0xff]  ;;  %v353_v11 = vrot.slane %v336_v8, 7  ;;  %2605 = vmatprep.subr.bf16.mxu1 %v4569_v46  ;;  %2585 = vmatprep.subr.bf16.mxu0 %v4569_v46 }
  0x14   : >> { %v356_v7 = vrot.slane %v338_v4, 7  ;;  %v360_v12 = vrot.slane %v340_v9, 7  ;;  %v352_v13 = vrot.slane %v335_v10, 7  ;;  %v339_v14 = vld [vmem:[%s2874_s17 + $0x30] sm:$0xff]  ;;  %v337_v15 = vld [vmem:[%s2874_s17 + $0x20] sm:$0xff]  ;;  %4664 = vst [vmem:[#allocation9_spill] sm:$0xff] %v2996_v55  ;;  %2619 = vmatprep.mubr.msk.bf16.mxu1 %vm2800_vm4, %v4569_v46  ;;  %2599 = vmatprep.mubr.msk.bf16.mxu0 %vm2800_vm4, %v4569_v46 }
  0x15   : >> { %375 = vst [vmem:[#allocation2 + $0x8] sm:$0xfe] %v351_v5  ;;  %374 = vst [vmem:[#allocation2] sm:$0xfe] %v350_v6  ;;  %v358_v16 = vrot.slane %v339_v14, 7  ;;  %v354_v17 = vrot.slane %v337_v15, 7 }
  0x16   : >> { %383 = vst [vmem:[#allocation2 + $0x48] sm:$0x1] %v356_v7  ;;  %377 = vst [vmem:[#allocation2 + $0x18] sm:$0xfe] %v353_v11  ;;  %v2893_v20 = vsel %vm349_vm1, %v351_v5, %v356_v7  ;;  %v2902_v22 = vsel %vm349_vm1, %v353_v11, %v360_v12  ;;  %2606 = vmatpush3.bf16.msra.mxu1 %v2980_v51  ;;  %2586 = vmatpush3.bf16.msra.mxu0 %v2980_v51  ;;  %v3037_v3 = vld [vmem:[%s4562_s3 + $0x20] sm:$0xff]   ;;  %v3057_v11 = vld [vmem:[%s4562_s3 + $0x28] sm:$0xff]  }
  0x17   : >> { %385 = vst [vmem:[#allocation2 + $0x58] sm:$0x1] %v360_v12  ;;  %376 = vst [vmem:[#allocation2 + $0x10] sm:$0xfe] %v352_v13  ;;  %v2915_v24 = vsel %vm349_vm1, %v352_v13, %v358_v16  ;;  %v2918_v25 = vsel %vm349_vm1, %v350_v6, %v354_v17  ;;  %v667_v33 = vrot.slane %v2893_v20, 1  ;;  %v673_v40 = vrot.slane %v2902_v22, 1  ;;  %2607 = vmatprep.subr.bf16.mxu1 %v4569_v46 }
  0x18   : >> { %384 = vst [vmem:[#allocation2 + $0x50] sm:$0x1] %v358_v16  ;;  %382 = vst [vmem:[#allocation2 + $0x40] sm:$0x1] %v354_v17  ;;  %v664_v28 = vrot.slane %v2918_v25, 1  ;;  %v670_v52 = vrot.slane %v2915_v24, 1  ;;  %2587 = vmatprep.subr.bf16.mxu0 %v4569_v46 }
  0x19   : >> { %4659 = vst [vmem:[#allocation4_spill] sm:$0xff] %v2902_v22  ;;  %4661 = vst [vmem:[#allocation6_spill] sm:$0xff] %v2915_v24  ;;  %v918_v61 = vrot.slane %v2918_v25, 2  ;;  %v921_v4 = vrot.slane %v2893_v20, 2  ;;  %v927_v12 = vrot.slane %v2902_v22, 2  ;;  %v3073_v17 = vld [vmem:[%s4562_s3 + $0x30] sm:$0xff]  }
  0x1a   : >> { %2608 = vmatpush3.bf16.msra.mxu1 %v2996_v55  ;;  %2588 = vmatpush3.bf16.msra.mxu0 %v2996_v55  ;;  %4665 = vst [vmem:[#allocation10_spill] sm:$0xff] %v3017_v60  ;;  %4666 = vst [vmem:[#allocation11_spill] sm:$0xff] %v3037_v3  ;;  %p326_p4 = scmp.ge.s32.totalorder %s329_s15, 2  }
  0x1b   : >> { %2609 = vmatprep.subr.bf16.mxu1 %v4569_v46  ;;  %2589 = vmatprep.subr.bf16.mxu0 %v4569_v46  ;;  %4667 = vst [vmem:[#allocation12_spill] sm:$0xff] %v3057_v11  ;;  %4668 = vst [vmem:[#allocation13_spill] sm:$0xff] %v3073_v17 }
  0x1c   : >> { %v2884_v18 = vld [vmem:[#allocation2 + $0x8] sm:$0xff]  ;;  %v2886_v19 = vld [vmem:[#allocation2] sm:$0xff] }
  0x1d   : >> { %429 = vrot.lane.b32.xlu1 %v2884_v18, %s2797_s18  ;;  %425 = vrot.lane.b32.xlu0 %v2886_v19, %s2797_s18  ;;  %v2895_v21 = vld [vmem:[#allocation2 + $0x18] sm:$0xff]  ;;  %v2920_v26 = vld [vmem:[#allocation2] sm:$0xfe]  ;;  %v2929_v29 = vld [vmem:[#allocation2 + $0x48] sm:$0x1] }
  0x1e   : >> { %4658 = vst [vmem:[#allocation3_spill] sm:$0xff] %v2895_v21  ;;  %v2908_v23 = vld [vmem:[#allocation2 + $0x10] sm:$0xff]  ;;  %v2931_v30 = vld [vmem:[#allocation2 + $0x8] sm:$0xfe]  ;;  %v663_v32 = vrot.slane %v2920_v26, 1  ;;  %v677_v36 = vrot.slane %v2929_v29, 1  ;;  %2610 = vmatpush3.bf16.msra.mxu1 %v3017_v60  ;;  %2590 = vmatpush3.bf16.msra.mxu0 %v3017_v60 }
  0x1f   : >> { %4660 = vst [vmem:[#allocation5_spill] sm:$0xff] %v2908_v23  ;;  %v2922_v27 = vld [vmem:[#allocation2 + $0x40] sm:$0x1]  ;;  %v666_v37 = vrot.slane %v2931_v30, 1  ;;  %v2944_v38 = vld [vmem:[#allocation2 + $0x58] sm:$0x1]  ;;  %2611 = vmatprep.subr.bf16.mxu1 %v4569_v46  ;;  %2591 = vmatprep.subr.bf16.mxu0 %v4569_v46 }
  0x20   : >> { %v675_v31 = vrot.slane %v2922_v27, 1  ;;  %v665_v35 = vsel %vm614_vm2, %v663_v32, %v664_v28  ;;  %v2946_v39 = vld [vmem:[#allocation2 + $0x18] sm:$0xfe]  ;;  %v678_v41 = vsel %vm614_vm2, %v667_v33, %v677_v36  ;;  %v681_v43 = vrot.slane %v2944_v38, 1  ;;  %v2972_v49 = vld [vmem:[#allocation2 + $0x50] sm:$0x1] }
  0x21   : >> { %431 = vrot.lane.b32.xlu1 %v2893_v20, %s2797_s18  ;;  %437 = vrot.lane.b32.xlu0 %v2895_v21, %s2797_s18  ;;  %v668_v42 = vsel %vm614_vm2, %v666_v37, %v667_v33  ;;  %v672_v44 = vrot.slane %v2946_v39, 1  ;;  %v2974_v50 = vld [vmem:[#allocation2 + $0x10] sm:$0xfe]  ;;  %v679_v53 = vrot.slane %v2972_v49, 1  ;;  %v3009_v58 = vld [vmem:[#allocation2 + $0x40] sm:$0x3] }
  0x22   : >> { %v676_v34 = vsel %vm614_vm2, %v664_v28, %v675_v31  ;;  %v2965_v47 = vsel %vm614_vm2, %v673_v40, %v681_v43  ;;  %v669_v54 = vrot.slane %v2974_v50, 1  ;;  %v3011_v59 = vld [vmem:[#allocation2] sm:$0xfc]  ;;  %v929_v62 = vrot.slane %v3009_v58, 2  ;;  %v3029_v1 = vld [vmem:[#allocation2 + $0x48] sm:$0x3]  ;;  %2612 = vmatpush3.bf16.msra.mxu1 %v3037_v3  ;;  %2592 = vmatpush3.bf16.msra.mxu0 %v3037_v3 }
  0x23   : >> { %v2968_v48 = vsel %vm614_vm2, %v672_v44, %v673_v40  ;;  %v3002_v56 = vsel %vm614_vm2, %v670_v52, %v679_v53  ;;  %v917_v63 = vrot.slane %v3011_v59, 2  ;;  %v3031_v2 = vld [vmem:[#allocation2 + $0x8] sm:$0xfc]  ;;  %v931_v7 = vrot.slane %v3029_v1, 2  ;;  %v3049_v9 = vld [vmem:[#allocation2 + $0x58] sm:$0x3]  ;;  %2613 = vmatprep.subr.bf16.mxu1 %v4569_v46  ;;  %2593 = vmatprep.subr.bf16.mxu0 %v4569_v46 }
  0x24   : >> { %v3005_v57 = vsel %vm614_vm2, %v669_v54, %v670_v52  ;;  %v930_v5 = vsel %vm872_vm3, %v918_v61, %v929_v62  ;;  %v920_v8 = vrot.slane %v3031_v2, 2  ;;  %v3051_v10 = vld [vmem:[#allocation2 + $0x18] sm:$0xfc]  ;;  %v935_v15 = vrot.slane %v3049_v9, 2  ;;  %v3082_v32 = vld [vmem:[#allocation2 + $0x50] sm:$0x3] }
  0x25   : >> { %439 = vrot.lane.b32.xlu1 %v2902_v22, %s2797_s18  ;;  %494 = vrot.lane.b32.xlu0 %v2884_v18, %s2798_s19  ;;  %v919_v6 = vsel %vm872_vm3, %v917_v63, %v918_v61  ;;  %v932_v13 = vsel %vm872_vm3, %v921_v4, %v931_v7  ;;  %v926_v16 = vrot.slane %v3051_v10, 2  ;;  %v3084_v33 = vld [vmem:[#allocation2 + $0x10] sm:$0xfc]  ;;  %v933_v36 = vrot.slane %v3082_v32, 2 }
  0x26   : >> { %v922_v14 = vsel %vm872_vm3, %v920_v8, %v921_v4  ;;  %2614 = vmatpush3.bf16.msra.mxu1 %v3057_v11  ;;  %2594 = vmatpush3.bf16.msra.mxu0 %v3057_v11  ;;  %v936_v28 = vsel %vm872_vm3, %v927_v12, %v935_v15  ;;  %v923_v37 = vrot.slane %v3084_v33, 2  ;;  %v398_v61 = vshrl.u32 %v4674_v0, 7  ;;  %v2474_v62 = vld [vmem:[%s4560_s1 + $0x11] ss:$4 sm:$0xf] }
  0x27   : >> { %2615 = vmatprep.subr.bf16.mxu1 %v4569_v46  ;;  %2595 = vmatprep.subr.bf16.mxu0 %v4569_v46  ;;  %v928_v31 = vsel %vm872_vm3, %v926_v16, %v927_v12  ;;  %v3170_v8 = vld [vmem:[%s4560_s1 + $0x1] ss:$4 sm:$0xf] }
  0x28   : >> { %v2477_v15 = vld [vmem:[%s4560_s1 + $0x21] ss:$4 sm:$0xf]  ;;  %v3180_v16 = vsub.s32 3, %v398_v61 }
  0x29   : >> { %496 = vrot.lane.b32.xlu1 %v2893_v20, %s2798_s19  ;;  %498 = vrot.lane.b32.xlu0 %v2908_v23, %s2798_s19 }
  0x2a   : >> { %2616 = vmatpush3.bf16.msra.mxu1 %v3073_v17  ;;  %2596 = vmatpush3.bf16.msra.mxu0 %v3073_v17  ;;  %4679 = vst [vmem:[#allocation23_spill] sm:$0xff] %v3180_v16 }
  0x2b   : >> { %2617 = vmatprep.subr.bf16.mxu1 %v4569_v46  ;;  %2597 = vmatprep.subr.bf16.mxu0 %v4569_v46 }
  0x2d   : >> { %500 = vrot.lane.b32.xlu1 %v2915_v24, %s2798_s19  ;;  %427 = vrot.lane.b32.xlu0 %v2918_v25, %s2797_s18 }
  0x31   : >> { %492 = vrot.lane.b32.xlu1 %v2918_v25, %s2798_s19  ;;  %490 = vrot.lane.b32.xlu0 %v2886_v19, %s2798_s19 }
  0x35   : >> { %693 = vrot.lane.b32.xlu1 %v676_v34, %s2797_s18  ;;  %691 = vrot.lane.b32.xlu0 %v665_v35, %s2797_s18 }
  0x39   : >> { %697 = vrot.lane.b32.xlu1 %v678_v41, %s2797_s18  ;;  %695 = vrot.lane.b32.xlu0 %v668_v42, %s2797_s18 }
  0x3d   : >> { %705 = vrot.lane.b32.xlu1 %v2965_v47, %s2797_s18  ;;  %703 = vrot.lane.b32.xlu0 %v2968_v48, %s2797_s18 }
  0x41   : >> { %759 = vrot.lane.b32.xlu1 %v678_v41, %s2798_s19  ;;  %757 = vrot.lane.b32.xlu0 %v668_v42, %s2798_s19 }
  0x45   : >> { %763 = vrot.lane.b32.xlu1 %v3002_v56, %s2798_s19  ;;  %761 = vrot.lane.b32.xlu0 %v3005_v57, %s2798_s19 }
  0x49   : >> { %755 = vrot.lane.b32.xlu1 %v676_v34, %s2798_s19  ;;  %753 = vrot.lane.b32.xlu0 %v665_v35, %s2798_s19  ;;  %v3090_v34 = vld [vmem:[%s4562_s3 + $0x38] sm:$0xff]   ;;  %v924_v35 = vrot.slane %v2915_v24, 2 }
  0x4a   : >> { %4669 = vst [vmem:[#allocation14_spill] sm:$0xff] %v3090_v34  ;;  %2618 = vmatpush3.bf16.msra.mxu1 %v3090_v34  ;;  %2598 = vmatpush3.bf16.msra.mxu0 %v3090_v34 }
  0x4b   : >> { %2643 = vmatprep.subr.bf16.mxu1 %v4569_v46  ;;  %2623 = vmatprep.subr.bf16.mxu0 %v4569_v46  ;;  %v934_v40 = vsel %vm872_vm3, %v924_v35, %v933_v36  ;;  %v925_v41 = vsel %vm872_vm3, %v923_v37, %v924_v35  ;;  %v3192_v36 = vld [vmem:[%s4560_s1] ss:$4 sm:$0xf]  ;;  %v3208_v46 = vld [vmem:[%s4560_s1 + $0x2] ss:$4 sm:$0xf] }
  0x4c   : >> { %4680 = vst [vmem:[#allocation24_spill] sm:$0xff] %v3192_v36 }
  0x4d   : >> { %947 = vrot.lane.b32.xlu1 %v930_v5, %s2797_s18  ;;  %945 = vrot.lane.b32.xlu0 %v919_v6, %s2797_s18 }
  0x51   : >> { %951 = vrot.lane.b32.xlu1 %v932_v13, %s2797_s18  ;;  %949 = vrot.lane.b32.xlu0 %v922_v14, %s2797_s18 }
  0x55   : >> { %959 = vrot.lane.b32.xlu1 %v936_v28, %s2797_s18  ;;  %957 = vrot.lane.b32.xlu0 %v928_v31, %s2797_s18 }
  0x59   : >> { %1013 = vrot.lane.b32.xlu1 %v932_v13, %s2798_s19  ;;  %1011 = vrot.lane.b32.xlu0 %v922_v14, %s2798_s19 }
  0x5d   : >> { %1017 = vrot.lane.b32.xlu1 %v934_v40, %s2798_s19  ;;  %1015 = vrot.lane.b32.xlu0 %v925_v41, %s2798_s19 }
  0x61   : >> { %1009 = vrot.lane.b32.xlu1 %v930_v5, %s2798_s19  ;;  %1007 = vrot.lane.b32.xlu0 %v919_v6, %s2798_s19  ;;  %v3162_v5 = vsub.s32 1, %v398_v61  ;;  %v3164_v6 = vsub.s32 0, %v398_v61 }
  0x63   : >> { %4677 = vst [vmem:[#allocation21_spill] sm:$0xff] %v3162_v5  ;;  %4678 = vst [vmem:[#allocation22_spill] sm:$0xff] %v3164_v6  ;;  %v577_v7 = vrot.slane %v2474_v62, %v3162_v5  ;;  %v573_v14 = vrot.slane %v2474_v62, %v3164_v6  ;;  %v404_v35 = vrot.slane %v3170_v8, %v3162_v5 }
  0x64   : >> { %v3230_v51 = vrot.slane %v3192_v36, %v3162_v5  ;;  %v3239_v45 = vrot.slane %v3192_v36, %v3164_v6 }
  0x65   : >> { %435 = vrot.lane.b32.xlu1 %v2915_v24, %s2797_s18  ;;  %433 = vrot.lane.b32.xlu0 %v2908_v23, %s2797_s18  ;;  %v3195_v37 = vmul.f32 %v577_v7, %v2893_v20  ;;  %v3215_v11 = vmul.f32 %v573_v14, %v2920_v26  ;;  %v599_v3 = vmul.f32 %v577_v7, %v2929_v29 }
  0x66   : >> { %v3225_v55 = vmul.f32 %v573_v14, %v2922_v27  ;;  %v400_v26 = vrot.slane %v3170_v8, %v3164_v6  ;;  %v3235_v29 = vmul.f32 %v404_v35, %v2884_v18  ;;  %v3243_v27 = vrot.slane %v3208_v46, %v3162_v5 }
  0x69   : >> { %504 = vrot.lane.b32.xlu1 %v2902_v22, %s2798_s19  ;;  %502 = vrot.lane.b32.xlu0 %v2895_v21, %s2798_s19  ;;  %v591_v21 = vmul.f32 %v577_v7, %v2931_v30  ;;  %v615_v30 = vrot.slane %v3215_v11, 1  ;;  %v629_v7 = vrot.slane %v599_v3, 1  ;;  %v417_v11 = vmul.f32 %v400_v26, %v2886_v19 }
  0x6d   : >> { %701 = vrot.lane.b32.xlu1 %v3002_v56, %s2797_s18  ;;  %699 = vrot.lane.b32.xlu0 %v3005_v57, %s2797_s18 }
  0x71   : >> { %767 = vrot.lane.b32.xlu1 %v2965_v47, %s2798_s19  ;;  %765 = vrot.lane.b32.xlu0 %v2968_v48, %s2798_s19 }
  0x75   : >> { %955 = vrot.lane.b32.xlu1 %v934_v40, %s2797_s18  ;;  %953 = vrot.lane.b32.xlu0 %v925_v41, %s2797_s18  ;;  %v3198_v40 = vrot.slane %v2474_v62, %v3180_v16 }
  0x77   : >> { %4681 = vst [vmem:[#allocation25_spill] sm:$0xff] %v3198_v40  ;;  %v3249_v23 = vmul.f32 %v3198_v40, %v2944_v38  ;;  %v3253_v18 = vmul.f32 %v3198_v40, %v2946_v39 }
  0x79   : >> { %1021 = vrot.lane.b32.xlu1 %v936_v28, %s2798_s19  ;;  %1019 = vrot.lane.b32.xlu0 %v928_v31, %s2798_s19  ;;  %v3182_v28 = vsub.s32 2, %v398_v61  ;;  %v3185_v31 = vand.u32 127, %v4674_v0  ;;  %v831_v61 = vrot.slane %v2477_v15, %v3164_v6  ;;  %v835_v0 = vrot.slane %v2477_v15, %v3162_v5  ;;  %4686 = vst [vmem:[#allocation30_spill] sm:$0xff] %v3253_v18  ;;  %v3313_v18 = vld [vmem:[%s4560_s1 + $0x10] ss:$4 sm:$0xf] }
  0x7b   : >> { %v3201_v41 = vrot.slane %v2474_v62, %v3182_v28  ;;  %v3219_v62 = vrot.slane %v2477_v15, %v3180_v16  ;;  %v3222_v60 = vrot.slane %v2477_v15, %v3182_v28  ;;  %vm443_vm5 = vcmp.lt.s32.totalorder %v3185_v31, 32 }
  0x7c   : >> { %v619_v15 = vrot.slane %v3195_v37, 1  ;;  %vm506_vm6 = vcmp.lt.s32.totalorder %v3185_v31, 96  ;;  %v3270_v39 = vmul.f32 %v831_v61, %v3009_v58  ;;  %v627_v37 = vrot.slane %v3225_v55, 1 }
  0x7d   : >> { %4682 = vst [vmem:[#allocation26_spill] sm:$0xff] %v3201_v41  ;;  %4684 = vst [vmem:[#allocation28_spill] sm:$0xff] %v3219_v62  ;;  %v3257_v22 = vmul.f32 %v3201_v41, %v2972_v49  ;;  %v3267_v38 = vmul.f32 %v3201_v41, %v2974_v50  ;;  %v3274_v49 = vmul.f32 %v831_v61, %v3011_v59  ;;  %v618_v59 = vrot.slane %v591_v21, 1 }
  0x7e   : >> { %4685 = vst [vmem:[#allocation29_spill] sm:$0xff] %v3222_v60  ;;  %v857_v40 = vmul.f32 %v835_v0, %v3029_v1  ;;  %v3282_v3 = vmul.f32 %v3219_v62, %v3049_v9  ;;  %v3286_v50 = vmul.f32 %v3219_v62, %v3051_v10  ;;  %v3290_v58 = vmul.f32 %v3222_v60, %v3082_v32  ;;  %v3347_v10 = vld [vmem:[%s4560_s1 + $0x12] ss:$4 sm:$0xf] }
  0x7f   : >> { %v594_v55 = vmul.f32 %v573_v14, %v2918_v25  ;;  %v885_v62 = vrot.slane %v3270_v39, 2  ;;  %v3304_v32 = vmul.f32 %v3222_v60, %v3084_v33  ;;  %v853_v21 = vmul.f32 %v835_v0, %v2893_v20 }
  0x80   : >> { %4688 = vst [vmem:[#allocation32_spill] sm:$0xff] %v3282_v3  ;;  %4689 = vst [vmem:[#allocation33_spill] sm:$0xff] %v3286_v50  ;;  %v873_v14 = vrot.slane %v3274_v49, 2  ;;  %v887_v1 = vrot.slane %v857_v40, 2  ;;  %v421_v40 = vmul.f32 %v400_v26, %v2918_v25  ;;  %v852_v39 = vmul.f32 %v831_v61, %v2918_v25 }
  0x81   : >> { %4690 = vst [vmem:[#allocation34_spill] sm:$0xff] %v3290_v58  ;;  %4691 = vst [vmem:[#allocation35_spill] sm:$0xff] %v3304_v32  ;;  %v616_v60 = vrot.slane %v594_v55, 1  ;;  %v877_v26 = vrot.slane %v853_v21, 2  ;;  %v630_v33 = vsel %vm614_vm2, %v619_v15, %v629_v7  ;;  %v724_v25 = vrot.slane %v3313_v18, %v3162_v5 }
  0x82   : >> { %v620_v61 = vsel %vm614_vm2, %v618_v59, %v619_v15  ;;  %v3359_v7 = vrot.slane %v3313_v18, %v3164_v6  ;;  %v874_v58 = vrot.slane %v852_v39, 2 }
  0x83   : >> { %v3367_v32 = vsel %vm614_vm2, %v615_v30, %v616_v60 }
  0x8f   : >> { %v3134_v42 = vpop.permute.xlu1 %429  ;;  %v3136_v43 = vpop.permute.xlu0 %425 }
  0x90   : >> { %4670 = vst [vmem:[#allocation15_spill] sm:$0xff] %v3134_v42 }
  0x93   : >> { %v3138_v44 = vpop.permute.xlu1 %431  ;;  %v3140_v52 = vpop.permute.xlu0 %437 }
  0x94   : >> { %4671 = vst [vmem:[#allocation16_spill] sm:$0xff] %v3140_v52  ;;  %v450_v55 = vsel %vm443_vm5, %v3140_v52, %v3136_v43 }
  0x97   : >> { %v3142_v47 = vpop.permute.xlu1 %439  ;;  %v3144_v53 = vpop.permute.xlu0 %494 }
  0x9b   : >> { %v3146_v48 = vpop.permute.xlu1 %496  ;;  %v3148_v54 = vpop.permute.xlu0 %498 }
  0x9c   : >> { %4672 = vst [vmem:[#allocation17_spill] sm:$0xff] %v3148_v54  ;;  %v509_v21 = vsel %vm506_vm6, %v3144_v53, %v3148_v54 }
  0x9d   : >> { %v539_v30 = vmul.f32 %v3243_v27, %v509_v21 }
  0x9f   : >> { %v3150_v56 = vpop.permute.xlu1 %500  ;;  %v3152_v57 = vpop.permute.xlu0 %427 }
  0xa0   : >> { %4673 = vst [vmem:[#allocation18_spill] sm:$0xff] %v3150_v56  ;;  %v449_v19 = vsel %vm443_vm5, %v3152_v57, %v3138_v44  ;;  %v451_v59 = vsel %vm443_vm5, %v3142_v47, %v3152_v57  ;;  %v3383_v57 = vrot.slane %v3347_v10, %v3164_v6  ;;  %v510_v54 = vsel %vm506_vm6, %v3146_v48, %v3150_v56 }
  0xa1   : >> { %v479_v50 = vmul.f32 %v3230_v51, %v449_v19  ;;  %v478_v21 = vmul.f32 %v3239_v45, %v451_v59 }
  0xa3   : >> { %v3158_v63 = vpop.permute.xlu1 %492  ;;  %v3160_v4 = vpop.permute.xlu0 %490 }
  0xa4   : >> { %4675 = vst [vmem:[#allocation19_spill] sm:$0xff] %v3158_v63  ;;  %4676 = vst [vmem:[#allocation20_spill] sm:$0xff] %v3160_v4  ;;  %v512_v39 = vsel %vm506_vm6, %v3158_v63, %v3146_v48 }
  0xa7   : >> { %v3172_v12 = vpop.permute.xlu1 %693  ;;  %v3174_v13 = vpop.permute.xlu0 %691 }
  0xab   : >> { %v3210_v34 = vpop.permute.xlu1 %697  ;;  %v3212_v17 = vpop.permute.xlu0 %695 }
  0xac   : >> { %4683 = vst [vmem:[#allocation27_spill] sm:$0xff] %v3212_v17 }
  0xaf   : >> { %v3260_v24 = vpop.permute.xlu1 %705  ;;  %v3262_v36 = vpop.permute.xlu0 %703 }
  0xb0   : >> { %4687 = vst [vmem:[#allocation31_spill] sm:$0xff] %v3260_v24  ;;  %v3278_v24 = vmul.f32 %v835_v0, %v3031_v2  ;;  %v422_v0 = vmul.f32 %v404_v35, %v2893_v20  ;;  %v448_v20 = vsel %vm443_vm5, %v3136_v43, %v3134_v42  ;;  %v521_v35 = vrot.slane %v3208_v46, %v3164_v6 }
  0xb1   : >> { %v3355_v43 = vsel %vm614_vm2, %v616_v60, %v627_v37  ;;  %v475_v15 = vmul.f32 %v3230_v51, %v448_v20  ;;  %v3376_v37 = vld [vmem:[%s4560_s1 + $0x20] ss:$4 sm:$0xf]  ;;  %v474_v51 = vmul.f32 %v3239_v45, %v450_v55  ;;  %v787_v20 = vrot.slane %v3347_v10, %v3162_v5 }
  0xb2   : >> { %v876_v2 = vrot.slane %v3278_v24, 2  ;;  %4696 = vst [vmem:[#allocation40_spill] sm:$0xff] %v3376_v37  ;;  %v3386_v60 = vsel %vm872_vm3, %v877_v26, %v887_v1  ;;  %v511_v55 = vsel %vm506_vm6, %v3160_v4, %v3144_v53  ;;  %v3404_v1 = vld [vmem:[%s4560_s1 + $0x22] ss:$4 sm:$0xf]  ;;  %v487_v42 = vadd.f32 %v479_v50, %v422_v0 }
  0xb3   : >> { %v3296_v41 = vpop.permute.xlu1 %759  ;;  %v3298_v9 = vpop.permute.xlu0 %757  ;;  %4697 = vst [vmem:[#allocation41_spill] sm:$0xff] %v3404_v1  ;;  %v3409_v56 = vrot.slane %v3376_v37, %v3162_v5  ;;  %v483_v48 = vadd.f32 %v475_v15, %v3235_v29  ;;  %v3420_v4 = vsel %vm872_vm3, %v874_v58, %v885_v62  ;;  %v3424_v45 = vrot.slane %v3376_v37, %v3164_v6  ;;  %v3437_v62 = vld [vmem:[%s4561_s2] sm:$0xf] }
  0xb4   : >> { %v3412_v52 = vsel %vm872_vm3, %v876_v2, %v877_v26  ;;  %v3427_v50 = vsel %vm872_vm3, %v873_v14, %v874_v58  ;;  %v543_v0 = vmul.f32 %v3243_v27, %v510_v54  ;;  %v542_v2 = vmul.f32 %v521_v35, %v512_v39  ;;  %4698 = vst [vmem:[#allocation42_spill] sm:$0xff] %v3437_v62 }
  0xb5   : >> { %v538_v26 = vmul.f32 %v521_v35, %v511_v55  ;;  %v3432_v29 = vrot.slane %v3404_v1, %v3162_v5  ;;  %v482_v15 = vadd.f32 %v474_v51, %v417_v11  ;;  %v547_v59 = vadd.f32 %v539_v30, %v483_v48 }
  0xb6   : >> { %v3441_v37 = vrot.slane %v3404_v1, %v3164_v6  ;;  %v408_v54 = vrot.slane %v3170_v8, %v3182_v28  ;;  %v486_v27 = vadd.f32 %v478_v21, %v421_v40  ;;  %v551_v58 = vadd.f32 %v543_v0, %v487_v42  ;;  %v4699_v40 = vld [vmem:[#allocation24_spill] sm:$0xff] }
  0xb7   : >> { %v3324_v24 = vpop.permute.xlu1 %763  ;;  %v3326_v49 = vpop.permute.xlu0 %761  ;;  %v712_v14 = vsel %vm443_vm5, %v3172_v12, %v3210_v34  ;;  %v711_v11 = vsel %vm443_vm5, %v3174_v13, %v3212_v17  ;;  %v412_v30 = vrot.slane %v3170_v8, %v3180_v16  ;;  %v3461_v42 = vrot.slane %v4699_v40, %v3182_v28 }
  0xb8   : >> { %4692 = vst [vmem:[#allocation36_spill] sm:$0xff] %v3324_v24  ;;  %4693 = vst [vmem:[#allocation37_spill] sm:$0xff] %v3326_v49  ;;  %v3465_v39 = vrot.slane %v4699_v40, %v3180_v16  ;;  %v3469_v55 = vrot.slane %v3437_v62, %v3162_v5  ;;  %v550_v21 = vadd.f32 %v542_v2, %v486_v27  ;;  %v4700_v40 = vld [vmem:[#allocation31_spill] sm:$0xff]  ;;  %v4701_v27 = vld [vmem:[#allocation6_spill] sm:$0xff] }
  0xb9   : >> { %v546_v48 = vadd.f32 %v538_v26, %v482_v15  ;;  %v772_v0 = vsel %vm506_vm6, %v3296_v41, %v3324_v24  ;;  %v771_v8 = vsel %vm506_vm6, %v3298_v9, %v3326_v49  ;;  %v742_v1 = vmul.f32 %v724_v25, %v712_v14 }
  0xba   : >> { %v738_v17 = vmul.f32 %v724_v25, %v711_v11  ;;  %v714_v5 = vsel %vm443_vm5, %v4700_v40, %v3172_v12  ;;  %v713_v2 = vsel %vm443_vm5, %v3262_v36, %v3174_v13  ;;  %v648_v26 = vadd.f32 %v630_v33, %v551_v58  ;;  %v4702_v11 = vld [vmem:[#allocation4_spill] sm:$0xff] }
  0xbb   : >> { %v3369_v3 = vpop.permute.xlu1 %755  ;;  %v3371_v19 = vpop.permute.xlu0 %753  ;;  %v644_v15 = vadd.f32 %v620_v61, %v547_v59  ;;  %v3488_v24 = vmul.f32 %v408_v54, %v4701_v27  ;;  %v3492_v49 = vrot.slane %v3437_v62, %v3164_v6  ;;  %v805_v25 = vmul.f32 %v787_v20, %v772_v0  ;;  %v4703_v0 = vld [vmem:[#allocation26_spill] sm:$0xff] }
  0xbc   : >> { %4694 = vst [vmem:[#allocation38_spill] sm:$0xff] %v3369_v3  ;;  %4695 = vst [vmem:[#allocation39_spill] sm:$0xff] %v3371_v19  ;;  %v801_v14 = vmul.f32 %v787_v20, %v771_v8  ;;  %v774_v12 = vsel %vm506_vm6, %v3369_v3, %v3296_v41  ;;  %v773_v13 = vsel %vm506_vm6, %v3371_v19, %v3298_v9 }
  0xbd   : >> { %v741_v59 = vmul.f32 %v3359_v7, %v714_v5  ;;  %v737_v58 = vmul.f32 %v3359_v7, %v713_v2  ;;  %v3509_v20 = vmul.f32 %v412_v30, %v4702_v11  ;;  %v596_v8 = vmul.f32 %v4703_v0, %v4701_v27 }
  0xbe   : >> { %v750_v41 = vadd.f32 %v742_v1, %v648_v26  ;;  %v746_v6 = vadd.f32 %v738_v17, %v644_v15  ;;  %v647_v62 = vadd.f32 %v3355_v43, %v550_v21  ;;  %v643_v9 = vadd.f32 %v3367_v32, %v546_v48  ;;  %v4704_v21 = vld [vmem:[#allocation5_spill] sm:$0xff] }
  0xbf   : >> { %v3415_v63 = vpop.permute.xlu1 %947  ;;  %v3417_v53 = vpop.permute.xlu0 %945  ;;  %v804_v19 = vmul.f32 %v3383_v57, %v774_v12  ;;  %v800_v3 = vmul.f32 %v3383_v57, %v773_v13  ;;  %v3526_v32 = vmul.f32 %v408_v54, %v4704_v21  ;;  %v4705_v48 = vld [vmem:[#allocation25_spill] sm:$0xff]  ;;  %v4706_v12 = vld [vmem:[#allocation3_spill] sm:$0xff]  ;;  %v3535_v0 = vrot.slane %v3208_v46, %v3182_v28 }
  0xc0   : >> { %v813_v1 = vadd.f32 %v805_v25, %v750_v41  ;;  %v809_v17 = vadd.f32 %v801_v14, %v746_v6  ;;  %v597_v57 = vmul.f32 %v4705_v48, %v4702_v11  ;;  %v749_v26 = vadd.f32 %v741_v59, %v647_v62 }
  0xc1   : >> { %v745_v15 = vadd.f32 %v737_v58, %v643_v9  ;;  %v3531_v13 = vmul.f32 %v412_v30, %v4706_v12  ;;  %v3549_v59 = vrot.slane %v3208_v46, %v3180_v16  ;;  %v622_v58 = vrot.slane %v596_v8, 1 }
  0xc2   : >> { %v812_v30 = vadd.f32 %v804_v19, %v749_v26  ;;  %v906_v41 = vadd.f32 %v3386_v60, %v813_v1 }
  0xc3   : >> { %v3453_v35 = vpop.permute.xlu1 %951  ;;  %v3455_v51 = vpop.permute.xlu0 %949  ;;  %v808_v14 = vadd.f32 %v800_v3, %v745_v15 }
  0xc4   : >> { %v966_v5 = vsel %vm443_vm5, %v3415_v63, %v3453_v35  ;;  %v965_v7 = vsel %vm443_vm5, %v3417_v53, %v3455_v51 }
  0xc5   : >> { %v996_v25 = vmul.f32 %v3409_v56, %v966_v5  ;;  %v992_v6 = vmul.f32 %v3409_v56, %v965_v7  ;;  %v902_v56 = vadd.f32 %v3412_v52, %v809_v17  ;;  %v3559_v7 = vrot.slane %v3313_v18, %v3182_v28 }
  0xc6   : >> { %v905_v17 = vadd.f32 %v3420_v4, %v812_v30  ;;  %v901_v21 = vadd.f32 %v3427_v50, %v808_v14 }
  0xc7   : >> { %v3502_v33 = vpop.permute.xlu1 %959  ;;  %v3504_v61 = vpop.permute.xlu0 %957  ;;  %v1004_v60 = vadd.f32 %v996_v25, %v906_v41 }
  0xc8   : >> { %v968_v54 = vsel %vm443_vm5, %v3502_v33, %v3415_v63  ;;  %v967_v62 = vsel %vm443_vm5, %v3504_v61, %v3417_v53  ;;  %v625_v63 = vrot.slane %v597_v57, 1  ;;  %v1000_v53 = vadd.f32 %v992_v6, %v902_v56 }
  0xc9   : >> { %v995_v3 = vmul.f32 %v3424_v45, %v968_v54  ;;  %v991_v19 = vmul.f32 %v3424_v45, %v967_v62  ;;  %v4707_v45 = vrot.slane %v3257_v22, 1  ;;  %v3580_v57 = vrot.slane %v3313_v18, %v3180_v16 }
  0xca   : >> { %v4709_v22 = vrot.slane %v3267_v38, 1 }
  0xcb   : >> { %v1014_v2 = vpop.permute.xlu1 %1013  ;;  %v1012_v43 = vpop.permute.xlu0 %1011  ;;  %v3576_v48 = vsel %vm614_vm2, %v622_v58, %v4707_v45  ;;  %v1003_v6 = vadd.f32 %v995_v3, %v905_v17  ;;  %v999_v54 = vadd.f32 %v991_v19, %v901_v21  ;;  %v4712_v3 = vld [vmem:[#allocation29_spill] sm:$0xff]  ;;  %v4715_v17 = vld [vmem:[#allocation15_spill] sm:$0xff] }
  0xcc   : >> { %v3594_v50 = vsel %vm614_vm2, %v4709_v22, %v622_v58  ;;  %v4710_v58 = vld [vmem:[#allocation30_spill] sm:$0xff] }
  0xcd   : >> { %v4711_v41 = vrot.slane %v4710_v58, 1  ;;  %v4720_v58 = vld [vmem:[#allocation19_spill] sm:$0xff] }
  0xcf   : >> { %v3553_v9 = vpop.permute.xlu1 %1017  ;;  %v3555_v5 = vpop.permute.xlu0 %1015  ;;  %v3609_v56 = vsel %vm614_vm2, %v4711_v41, %v625_v63 }
  0xd0   : >> { %v1026_v46 = vsel %vm506_vm6, %v1014_v2, %v3553_v9  ;;  %v1025_v52 = vsel %vm506_vm6, %v1012_v43, %v3555_v5 }
  0xd1   : >> { %v1059_v8 = vmul.f32 %v3432_v29, %v1026_v46  ;;  %v1055_v1 = vmul.f32 %v3432_v29, %v1025_v52  ;;  %v4708_v29 = vrot.slane %v3249_v23, 1 }
  0xd3   : >> { %v1067_v26 = vadd.f32 %v1059_v8, %v1004_v60  ;;  %v1063_v15 = vadd.f32 %v1055_v1, %v1000_v53  ;;  %v3582_v12 = vpop.permute.xlu1 %1009  ;;  %v3584_v25 = vpop.permute.xlu0 %1007  ;;  %v3589_v4 = vsel %vm614_vm2, %v625_v63, %v4708_v29  ;;  %v4713_v63 = vld [vmem:[#allocation28_spill] sm:$0xff] }
  0xd4   : >> { %v1028_v18 = vsel %vm506_vm6, %v3582_v12, %v1014_v2  ;;  %v1027_v62 = vsel %vm506_vm6, %v3584_v25, %v1012_v43  ;;  %v3613_v2 = vrot.slane %v3347_v10, %v3182_v28  ;;  %v3617_v43 = vrot.slane %v3347_v10, %v3180_v16  ;;  %v4714_v1 = vld [vmem:[#allocation16_spill] sm:$0xff] }
  0xd5   : >> { %v1058_v23 = vmul.f32 %v3441_v37, %v1028_v18  ;;  %v1054_v30 = vmul.f32 %v3441_v37, %v1027_v62  ;;  %v1093_v14 = vadd.f32 %v3469_v55, %v1063_v15  ;;  %v1097_v38 = vadd.f32 %v3469_v55, %v1067_v26  ;;  %v4716_v15 = vld [vmem:[#allocation7_spill] sm:$0xff] }
  0xd6   : >> { %v3621_v37 = vmul.f32 %v4712_v3, %v4701_v27  ;;  %v3625_v53 = vmul.f32 %v4713_v63, %v4702_v11  ;;  %v4718_v18 = vmov 0.0   ;;  %v4721_v3 = vld [vmem:[#allocation17_spill] sm:$0xff]  ;;  %v4724_v63 = vld [vmem:[#allocation34_spill] sm:$0xff] }
  0xd7   : >> { %v1066_v19 = vadd.f32 %v1058_v23, %v1003_v6  ;;  %v1062_v46 = vadd.f32 %v1054_v30, %v999_v54  ;;  %v436_v55 = vpop.permute.xlu1 %435  ;;  %v434_v52 = vpop.permute.xlu0 %433  ;;  %v1206_v60 = vpack.c.bf16 %v1097_v38, %v1093_v14  ;;  %v4717_v6 = vld [vmem:[#allocation40_spill] sm:$0xff] }
  0xd8   : >> { %v445_v8 = vsel %vm443_vm5, %v436_v55, %v3142_v47  ;;  %v447_v10 = vsel %vm443_vm5, %v3138_v44, %v436_v55  ;;  %v444_v27 = vsel %vm443_vm5, %v434_v52, %v4714_v1  ;;  %v446_v21 = vsel %vm443_vm5, %v4715_v17, %v434_v52  ;;  %v4723_v52 = vld [vmem:[#allocation8_spill] sm:$0xff] }
  0xd9   : >> { %v480_v45 = vmul.f32 %v3461_v42, %v447_v10  ;;  %v481_v11 = vmul.f32 %v3465_v39, %v445_v8  ;;  %v476_v26 = vmul.f32 %v3461_v42, %v446_v21  ;;  %v477_v47 = vmul.f32 %v3465_v39, %v444_v27  ;;  %2620 = vmatmul.mubr.bf16.vlgmr.msra.gmra.mrb[0].mxu1 %v1206_v60 }
  0xda   : >> { %2644 = vmatpush3.bf16.msra.mxu1 %v4716_v15  ;;  %v1092_v44 = vadd.f32 %v3492_v49, %v1062_v46  ;;  %v1096_v29 = vadd.f32 %v3492_v49, %v1066_v19  ;;  %v880_v22 = vrot.slane %v3621_v37, 2  ;;  %v3649_v54 = vrot.slane %v4717_v6, %v3182_v28  ;;  %2659 = vmatprep.mubr.msk.bf16.mxu1 %vm2800_vm4, %v4718_v18  ;;  %v4719_v49 = vld [vmem:[#allocation18_spill] sm:$0xff] }
  0xdb   : >> { %v488_v42 = vadd.f32 %v480_v45, %v3488_v24  ;;  %v489_v39 = vadd.f32 %v481_v11, %v3509_v20  ;;  %v484_v62 = vadd.f32 %v476_v26, %v3526_v32  ;;  %v485_v23 = vadd.f32 %v477_v47, %v3531_v13  ;;  %v505_v30 = vpop.permute.xlu1 %504  ;;  %v503_v14 = vpop.permute.xlu0 %502  ;;  %2645 = vmatprep.subr.bf16.mxu1 %v4718_v18  ;;  %v4722_v20 = vld [vmem:[#allocation20_spill] sm:$0xff]  ;;  %v4726_v47 = vld [vmem:[#allocation27_spill] sm:$0xff] }
  0xdc   : >> { %v508_v38 = vsel %vm506_vm6, %v4719_v49, %v505_v30  ;;  %v514_v41 = vsel %vm506_vm6, %v505_v30, %v4720_v58  ;;  %v507_v24 = vsel %vm506_vm6, %v4721_v3, %v503_v14  ;;  %v513_v32 = vsel %vm506_vm6, %v503_v14, %v4722_v20  ;;  %v4733_v3 = vld [vmem:[#allocation38_spill] sm:$0xff] }
  0xdd   : >> { %v544_v13 = vmul.f32 %v3535_v0, %v508_v38  ;;  %v545_v37 = vmul.f32 %v3549_v59, %v514_v41  ;;  %v540_v19 = vmul.f32 %v3535_v0, %v507_v24  ;;  %v541_v46 = vmul.f32 %v3549_v59, %v513_v32  ;;  %v4730_v38 = vld [vmem:[#allocation35_spill] sm:$0xff]  ;;  %v4734_v32 = vld [vmem:[#allocation37_spill] sm:$0xff] }
  0xde   : >> { %v1116_v55 = vpack.c.bf16 %v1096_v29, %v1092_v44  ;;  %2646 = vmatpush3.bf16.msra.mxu1 %v4723_v52  ;;  %v883_v60 = vrot.slane %v3625_v53, 2  ;;  %v4725_v8 = vrot.slane %v4724_v63, 2  ;;  %v3681_v1 = vrot.slane %v4717_v6, %v3180_v16 }
  0xdf   : >> { %v552_v27 = vadd.f32 %v544_v13, %v488_v42  ;;  %v553_v17 = vadd.f32 %v545_v37, %v489_v39  ;;  %v548_v21 = vadd.f32 %v540_v19, %v484_v62  ;;  %v549_v45 = vadd.f32 %v541_v46, %v485_v23  ;;  %v702_v0 = vpop.permute.xlu1 %701  ;;  %v700_v11 = vpop.permute.xlu0 %699  ;;  %2647 = vmatprep.subr.bf16.mxu1 %v4718_v18  ;;  %v4735_v37 = vld [vmem:[#allocation39_spill] sm:$0xff] }
  0xe0   : >> { %v890_v10 = vsel %vm872_vm3, %v880_v22, %v4725_v8  ;;  %2600 = vmatmul.mubr.bf16.vlgmr.msra.gmra.mrb[0].mxu0 %v1116_v55  ;;  %v708_v59 = vsel %vm443_vm5, %v702_v0, %v4700_v40  ;;  %v710_v53 = vsel %vm443_vm5, %v3210_v34, %v702_v0  ;;  %v707_v26 = vsel %vm443_vm5, %v700_v11, %v3262_v36 }
  0xe1   : >> { %v709_v44 = vsel %vm443_vm5, %v4726_v47, %v700_v11  ;;  %2624 = vmatpush3.bf16.msra.mxu0 %v4716_v15  ;;  %v649_v29 = vadd.f32 %v3576_v48, %v552_v27  ;;  %v650_v6 = vadd.f32 %v3589_v4, %v553_v17  ;;  %v743_v40 = vmul.f32 %v3559_v7, %v710_v53  ;;  %v4727_v15 = vld [vmem:[#allocation9_spill] sm:$0xff]  ;;  %v4728_v4 = vld [vmem:[#allocation32_spill] sm:$0xff] }
  0xe2   : >> { %v744_v42 = vmul.f32 %v3580_v57, %v708_v59  ;;  %v645_v34 = vadd.f32 %v3594_v50, %v548_v21  ;;  %v646_v39 = vadd.f32 %v3609_v56, %v549_v45  ;;  %v739_v36 = vmul.f32 %v3559_v7, %v709_v44  ;;  %2625 = vmatprep.subr.bf16.mxu0 %v4718_v18  ;;  %v4732_v56 = vld [vmem:[#allocation36_spill] sm:$0xff]  ;;  %v4738_v45 = vld [vmem:[#allocation10_spill] sm:$0xff]  ;;  %v4739_v59 = vld [vmem:[#allocation41_spill] sm:$0xff] }
  0xe3   : >> { %v740_v62 = vmul.f32 %v3580_v57, %v707_v26  ;;  %v751_v23 = vadd.f32 %v743_v40, %v649_v29  ;;  %2648 = vmatpush3.bf16.msra.mxu1 %v4727_v15  ;;  %v768_v48 = vpop.permute.xlu1 %767  ;;  %v766_v30 = vpop.permute.xlu0 %765  ;;  %v4729_v14 = vrot.slane %v4728_v4, 2  ;;  %v4731_v58 = vrot.slane %v4730_v38, 2  ;;  %2639 = vmatprep.mubr.msk.bf16.mxu0 %vm2800_vm4, %v4718_v18 }
  0xe4   : >> { %v752_v7 = vadd.f32 %v744_v42, %v650_v6  ;;  %v747_v57 = vadd.f32 %v739_v36, %v645_v34  ;;  %v770_v41 = vsel %vm506_vm6, %v4732_v56, %v768_v48  ;;  %v776_v24 = vsel %vm506_vm6, %v768_v48, %v4733_v3  ;;  %2649 = vmatprep.subr.bf16.mxu1 %v4718_v18  ;;  %v4740_v36 = vld [vmem:[#allocation11_spill] sm:$0xff] }
  0xe5   : >> { %v892_v49 = vsel %vm872_vm3, %v883_v60, %v4729_v14  ;;  %v881_v50 = vsel %vm872_vm3, %v4731_v58, %v880_v22  ;;  %2626 = vmatpush3.bf16.msra.mxu0 %v4723_v52  ;;  %v806_v20 = vmul.f32 %v3613_v2, %v770_v41  ;;  %v807_v22 = vmul.f32 %v3617_v43, %v776_v24  ;;  %v4736_v52 = vld [vmem:[#allocation33_spill] sm:$0xff] }
  0xe6   : >> { %v769_v13 = vsel %vm506_vm6, %v4734_v32, %v766_v30  ;;  %v775_v19 = vsel %vm506_vm6, %v766_v30, %v4735_v37  ;;  %v748_v46 = vadd.f32 %v740_v62, %v646_v39  ;;  %2627 = vmatprep.subr.bf16.mxu0 %v4718_v18  ;;  %v4737_v8 = vrot.slane %v4736_v52, 2  ;;  %v4741_v62 = vld [vmem:[#allocation42_spill] sm:$0xff] }
  0xe7   : >> { %v802_v55 = vmul.f32 %v3613_v2, %v769_v13  ;;  %v803_v63 = vmul.f32 %v3617_v43, %v775_v19  ;;  %v814_v17 = vadd.f32 %v806_v20, %v751_v23  ;;  %v815_v21 = vadd.f32 %v807_v22, %v752_v7  ;;  %2650 = vmatpush3.bf16.msra.mxu1 %v4738_v45  ;;  %v956_v0 = vpop.permute.xlu1 %955  ;;  %v954_v11 = vpop.permute.xlu0 %953  ;;  %v4743_v22 = vld [vmem:[#allocation13_spill] sm:$0xff]  ;;  %v4744_v37 = vld [vmem:[#allocation14_spill] sm:$0xff] }
  0xe8   : >> { %v884_v27 = vsel %vm872_vm3, %v4737_v8, %v883_v60  ;;  %v1045_v53 = vrot.slane %v4739_v59, %v3182_v28  ;;  %v1049_v2 = vrot.slane %v4739_v59, %v3180_v16  ;;  %v962_v47 = vsel %vm443_vm5, %v956_v0, %v3502_v33  ;;  %2651 = vmatprep.subr.bf16.mxu1 %v4718_v18 }
  0xe9   : >> { %v810_v26 = vadd.f32 %v802_v55, %v747_v57  ;;  %v811_v43 = vadd.f32 %v803_v63, %v748_v46  ;;  %v964_v60 = vsel %vm443_vm5, %v3453_v35, %v956_v0  ;;  %2628 = vmatpush3.bf16.msra.mxu0 %v4727_v15  ;;  %v907_v44 = vadd.f32 %v890_v10, %v814_v17  ;;  %v4742_v57 = vld [vmem:[#allocation12_spill] sm:$0xff] }
  0xea   : >> { %v908_v29 = vadd.f32 %v892_v49, %v815_v21  ;;  %v997_v6 = vmul.f32 %v3649_v54, %v964_v60  ;;  %v998_v40 = vmul.f32 %v3681_v1, %v962_v47  ;;  %v961_v33 = vsel %vm443_vm5, %v954_v11, %v3504_v61  ;;  %2629 = vmatprep.subr.bf16.mxu0 %v4718_v18  ;;  %v3802_v21 = vld [vmem:[%s4563_s4 + $0x11] ss:$4 sm:$0xf] }
  0xeb   : >> { %v903_v42 = vadd.f32 %v881_v50, %v810_v26  ;;  %v904_v34 = vadd.f32 %v884_v27, %v811_v43  ;;  %v963_v35 = vsel %vm443_vm5, %v3455_v51, %v954_v11  ;;  %v994_v10 = vmul.f32 %v3681_v1, %v961_v33  ;;  %2652 = vmatpush3.bf16.msra.mxu1 %v4740_v36  ;;  %v1022_v48 = vpop.permute.xlu1 %1021  ;;  %v1020_v61 = vpop.permute.xlu0 %1019 }
  0xec   : >> { %v993_v39 = vmul.f32 %v3649_v54, %v963_v35  ;;  %v1083_v23 = vrot.slane %v4741_v62, %v3182_v28  ;;  %v1087_v15 = vrot.slane %v4741_v62, %v3180_v16  ;;  %v1024_v51 = vsel %vm506_vm6, %v3553_v9, %v1022_v48  ;;  %2653 = vmatprep.subr.bf16.mxu1 %v4718_v18 }
  0xed   : >> { %v1030_v54 = vsel %vm506_vm6, %v1022_v48, %v3582_v12  ;;  %v1023_v1 = vsel %vm506_vm6, %v3555_v5, %v1020_v61  ;;  %v1029_v30 = vsel %vm506_vm6, %v1020_v61, %v3584_v25  ;;  %v1005_v4 = vadd.f32 %v997_v6, %v907_v44  ;;  %2630 = vmatpush3.bf16.msra.mxu0 %v4738_v45  ;;  %v3807_v45 = vld [vmem:[%s4563_s4 + $0x21] ss:$4 sm:$0xf] }
  0xee   : >> { %v1006_v14 = vadd.f32 %v998_v40, %v908_v29  ;;  %v1060_v49 = vmul.f32 %v1045_v53, %v1024_v51  ;;  %v1061_v9 = vmul.f32 %v1049_v2, %v1030_v54  ;;  %v1001_v38 = vadd.f32 %v993_v39, %v903_v42  ;;  %2631 = vmatprep.subr.bf16.mxu0 %v4718_v18 }
  0xef   : >> { %v1002_v58 = vadd.f32 %v994_v10, %v904_v34  ;;  %v1056_v50 = vmul.f32 %v1045_v53, %v1023_v1  ;;  %v1057_v12 = vmul.f32 %v1049_v2, %v1029_v30  ;;  %2654 = vmatpush3.bf16.msra.mxu1 %v4742_v57  ;;  %v4745_v2 = vld [vmem:[#allocation21_spill] sm:$0xff] }
  0xf0   : >> { %v1068_v7 = vadd.f32 %v1060_v49, %v1005_v4  ;;  %v1069_v5 = vadd.f32 %v1061_v9, %v1006_v14  ;;  %2655 = vmatprep.subr.bf16.mxu1 %v4718_v18  ;;  %v1567_v26 = vrot.slane %v3802_v21, %v4745_v2  ;;  %v1824_v47 = vrot.slane %v3807_v45, %v4745_v2 }
  0xf1   : >> { %v1064_v56 = vadd.f32 %v1056_v50, %v1001_v38  ;;  %v1065_v25 = vadd.f32 %v1057_v12, %v1002_v58  ;;  %2632 = vmatpush3.bf16.msra.mxu0 %v4740_v36  ;;  %v4746_v36 = vld [vmem:[#allocation22_spill] sm:$0xff] }
  0xf2   : >> { %v1098_v41 = vadd.f32 %v1083_v23, %v1068_v7  ;;  %v1099_v3 = vadd.f32 %v1087_v15, %v1069_v5  ;;  %2633 = vmatprep.subr.bf16.mxu0 %v4718_v18  ;;  %v1563_v62 = vrot.slane %v3802_v21, %v4746_v36  ;;  %v1820_v30 = vrot.slane %v3807_v45, %v4746_v36 }
  0xf3   : >> { %v1094_v24 = vadd.f32 %v1083_v23, %v1064_v56  ;;  %v1095_v20 = vadd.f32 %v1087_v15, %v1065_v25  ;;  %2656 = vmatpush3.bf16.msra.mxu1 %v4743_v22 }
  0xf4   : >> { %2657 = vmatprep.subr.bf16.mxu1 %v4718_v18 }
  0xf5   : >> { %v1290_v32 = vpack.c.bf16 %v1099_v3, %v1095_v20  ;;  %v1248_v13 = vpack.c.bf16 %v1098_v41, %v1094_v24  ;;  %2634 = vmatpush3.bf16.msra.mxu0 %v4742_v57 }
  0xf6   : >> { %2635 = vmatprep.subr.bf16.mxu0 %v4718_v18 }
  0xf7   : >> { %2658 = vmatpush3.bf16.msra.mxu1 %v4744_v37 }
  0xf8   : >> { %2683 = vmatprep.subr.bf16.mxu1 %v4718_v18 }
  0xf9   : >> { %2636 = vmatpush3.bf16.msra.mxu0 %v4743_v22 }
  0xfa   : >> { %2637 = vmatprep.subr.bf16.mxu0 %v4718_v18  ;;  %2660 = vmatmul.mubr.bf16.vlgmr.msra.gmra.mrb[4].mxu1 %v1290_v32 }
  0xfb   : >> { %2699 = vmatprep.mubr.msk.bf16.mxu1 %vm2800_vm4, %v4718_v18 }
  0xfd   : >> { %2638 = vmatpush3.bf16.msra.mxu0 %v4744_v37 }
  0xfe   : >> { %2663 = vmatprep.subr.bf16.mxu0 %v4718_v18 }
 0x100   : >> { %2640 = vmatmul.mubr.bf16.vlgmr.msra.gmra.mrb[4].mxu0 %v1248_v13 }
 0x101   : >> { %2679 = vmatprep.mubr.msk.bf16.mxu0 %vm2800_vm4, %v4718_v18 }
 0x1ac   : >> { %v1241_v19 = vpop.f32.mrb[0].mxu1 }
 0x1ad   : >> { %v1333_v46 = vmax.f32 %v1241_v19, 0.0  ;;  %v2621_v55 = vpop.f32.mrb[1].mxu1 }
 0x1ae   : >> { %v1244_v63 = vpop.f32.mrb[2].mxu1 }
 0x1af   : >> { %v1349_v52 = vrot.slane %v1333_v46, 7  ;;  %v1337_v8 = vmax.f32 %v1244_v63, 0.0  ;;  %v2622_v27 = vpop.f32.mrb[3].mxu1 }
 0x1b1   : >> { %1373 = vst [vmem:[#allocation2 + $0x8] sm:$0xfe] %v1349_v52  ;;  %v1354_v17 = vrot.slane %v1337_v8, 7 }
 0x1b3   : >> { %v3810_v0 = vsel %vm349_vm1, %v1349_v52, %v1354_v17  ;;  %1381 = vst [vmem:[#allocation2 + $0x48] sm:$0x1] %v1354_v17  ;;  %v1199_v11 = vpop.f32.mrb[0].mxu0 }
 0x1b4   : >> { %v1332_v59 = vmax.f32 %v1199_v11, 0.0  ;;  %v2601_v53 = vpop.f32.mrb[1].mxu0  ;;  %v1585_v34 = vmul.f32 %v1567_v26, %v3810_v0  ;;  %v1842_v39 = vmul.f32 %v1824_v47, %v3810_v0 }
 0x1b5   : >> { %v1202_v43 = vpop.f32.mrb[2].mxu0 }
 0x1b6   : >> { %v1348_v60 = vrot.slane %v1332_v59, 7  ;;  %v1336_v44 = vmax.f32 %v1202_v43, 0.0  ;;  %v2602_v29 = vpop.f32.mrb[3].mxu0  ;;  %v1608_v54 = vrot.slane %v1585_v34, 1  ;;  %v1865_v14 = vrot.slane %v1842_v39, 2 }
 0x1b8   : >> { %1372 = vst [vmem:[#allocation2] sm:$0xfe] %v1348_v60  ;;  %v1352_v6 = vrot.slane %v1336_v44, 7  ;;  %v3816_v40 = vld [vmem:[#allocation2 + $0x8] sm:$0xfe] }
 0x1b9   : >> { %v3818_v42 = vld [vmem:[#allocation2 + $0x8] sm:$0xfc]  ;;  %v1581_v33 = vmul.f32 %v1567_v26, %v3816_v40 }
 0x1ba   : >> { %v1838_v35 = vmul.f32 %v1824_v47, %v3818_v42  ;;  %v3825_v10 = vsel %vm349_vm1, %v1348_v60, %v1352_v6  ;;  %1380 = vst [vmem:[#allocation2 + $0x40] sm:$0x1] %v1352_v6  ;;  %v1553_v23 = vld [vmem:[#allocation2 + $0x48] sm:$0x1] }
 0x1bb   : >> { %v3829_v15 = vld [vmem:[#allocation2 + $0x48] sm:$0x3]  ;;  %1425 = vrot.lane.b32.xlu1 %v3825_v10, %s2797_s18  ;;  %v1607_v48 = vrot.slane %v1581_v33, 1  ;;  %v1589_v61 = vmul.f32 %v1567_v26, %v1553_v23  ;;  %v1584_v9 = vmul.f32 %v1563_v62, %v3825_v10  ;;  %v1841_v24 = vmul.f32 %v1820_v30, %v3825_v10 }
 0x1bc   : >> { %v1864_v51 = vrot.slane %v1838_v35, 2  ;;  %v1846_v4 = vmul.f32 %v1824_v47, %v3829_v15  ;;  %v3861_v13 = vld [vmem:[#allocation2 + $0x8] sm:$0xff]  ;;  %v1653_v59 = vrot.slane %v3825_v10, 1  ;;  %v1666_v26 = vrot.slane %v1553_v23, 1 }
 0x1bd   : >> { %v1618_v1 = vrot.slane %v1589_v61, 1  ;;  %v3837_v49 = vsel %vm614_vm2, %v1607_v48, %v1608_v54  ;;  %v1605_v32 = vrot.slane %v1584_v9, 1  ;;  %v1862_v52 = vrot.slane %v1841_v24, 2 }
 0x1be   : >> { %v1875_v12 = vrot.slane %v1846_v4, 2  ;;  %v3850_v5 = vsel %vm872_vm3, %v1864_v51, %v1865_v14  ;;  %v1656_v47 = vrot.slane %v3810_v0, 1  ;;  %v1655_v35 = vrot.slane %v3816_v40, 1 }
 0x1bf   : >> { %v3840_v38 = vld [vmem:[#allocation2] sm:$0xff]  ;;  %1429 = vrot.lane.b32.xlu1 %v3810_v0, %s2797_s18  ;;  %v3847_v7 = vsel %vm614_vm2, %v1608_v54, %v1618_v1  ;;  %4747 = vst [vmem:[#allocation24_spill] sm:$0xff] %v3850_v5  ;;  %v1575_v4 = vrot.slane %v3802_v21, %v3180_v16 }
 0x1c0   : >> { %v1548_v58 = vld [vmem:[#allocation2] sm:$0xfe]  ;;  %1423 = vrot.lane.b32.xlu0 %v3840_v38, %s2797_s18  ;;  %v3858_v3 = vsel %vm872_vm3, %v1865_v14, %v1875_v12  ;;  %v1667_v6 = vsel %vm614_vm2, %v1656_v47, %v1666_v26  ;;  %v1657_v51 = vsel %vm614_vm2, %v1655_v35, %v1656_v47  ;;  %v1828_v26 = vrot.slane %v3807_v45, %v3182_v28 }
 0x1c1   : >> { %v3844_v50 = vld [vmem:[#allocation2] sm:$0xfc]  ;;  %v1580_v57 = vmul.f32 %v1563_v62, %v1548_v58  ;;  %v1552_v25 = vld [vmem:[#allocation2 + $0x40] sm:$0x1]  ;;  %v1652_v43 = vrot.slane %v1548_v58, 1 }
 0x1c2   : >> { %v1837_v56 = vmul.f32 %v1820_v30, %v3844_v50  ;;  %v3855_v41 = vld [vmem:[#allocation2 + $0x40] sm:$0x3]  ;;  %v1588_v22 = vmul.f32 %v1563_v62, %v1552_v25  ;;  %v1664_v8 = vrot.slane %v1552_v25, 1 }
 0x1c3   : >> { %v1604_v20 = vrot.slane %v1580_v57, 1  ;;  %1487 = vrot.lane.b32.xlu1 %v3825_v10, %s2798_s19  ;;  %v1845_v19 = vmul.f32 %v1820_v30, %v3855_v41  ;;  %v1654_v33 = vsel %vm614_vm2, %v1652_v43, %v1653_v59  ;;  %v1917_v12 = vrot.slane %v3855_v41, 2 }
 0x1c4   : >> { %v1861_v37 = vrot.slane %v1837_v56, 2  ;;  %1427 = vrot.lane.b32.xlu0 %v3861_v13, %s2797_s18  ;;  %v1616_v46 = vrot.slane %v1588_v22, 1  ;;  %v1665_v53 = vsel %vm614_vm2, %v1653_v59, %v1664_v8  ;;  %v1906_v56 = vrot.slane %v3825_v10, 2 }
 0x1c5   : >> { %v3869_v55 = vsel %vm614_vm2, %v1604_v20, %v1605_v32  ;;  %v1873_v63 = vrot.slane %v1845_v19, 2  ;;  %v1919_v41 = vrot.slane %v3829_v15, 2  ;;  %v1905_v19 = vrot.slane %v3844_v50, 2 }
 0x1c6   : >> { %v3872_v27 = vsel %vm614_vm2, %v1605_v32, %v1616_v46  ;;  %v3877_v17 = vsel %vm872_vm3, %v1861_v37, %v1862_v52  ;;  %v1918_v22 = vsel %vm872_vm3, %v1906_v56, %v1917_v12  ;;  %v1909_v15 = vrot.slane %v3810_v0, 2 }
 0x1c7   : >> { %1491 = vrot.lane.b32.xlu1 %v3810_v0, %s2798_s19  ;;  %4748 = vst [vmem:[#allocation31_spill] sm:$0xff] %v3877_v17  ;;  %v3880_v11 = vsel %vm872_vm3, %v1862_v52, %v1873_v63  ;;  %v1571_v63 = vrot.slane %v3802_v21, %v3182_v28  ;;  %v1832_v52 = vrot.slane %v3807_v45, %v3180_v16  ;;  %v1908_v21 = vrot.slane %v3818_v42, 2 }
 0x1c8   : >> { %1485 = vrot.lane.b32.xlu0 %v3840_v38, %s2798_s19  ;;  %v1920_v47 = vsel %vm872_vm3, %v1909_v15, %v1919_v41 }
 0x1cb   : >> { %1682 = vrot.lane.b32.xlu1 %v1665_v53, %s2797_s18 }
 0x1cc   : >> { %1489 = vrot.lane.b32.xlu0 %v3861_v13, %s2798_s19 }
 0x1cd   : >> { %v1325_v60 = vpop.f32.mrb[4].mxu1 }
 0x1ce   : >> { %v1335_v44 = vmax.f32 %v1325_v60, 0.0  ;;  %v2661_v29 = vpop.f32.mrb[5].mxu1 }
 0x1cf   : >> { %v1328_v34 = vpop.f32.mrb[6].mxu1  ;;  %1686 = vrot.lane.b32.xlu1 %v1667_v6, %s2797_s18  ;;  %v1907_v29 = vsel %vm872_vm3, %v1905_v19, %v1906_v56  ;;  %v3974_v56 = vld [vmem:[%s4565_s6 + $0x8] sm:$0xff]  }
 0x1d0   : >> { %v1351_v39 = vrot.slane %v1335_v44, 7  ;;  %v1339_v62 = vmax.f32 %v1328_v34, 0.0  ;;  %1680 = vrot.lane.b32.xlu0 %v1654_v33, %s2797_s18  ;;  %v2662_v23 = vpop.f32.mrb[7].mxu1  ;;  %4752 = vst [vmem:[#allocation5_spill] sm:$0xff] %v3974_v56 }
 0x1d2   : >> { %1375 = vst [vmem:[#allocation2 + $0x18] sm:$0xfe] %v1351_v39  ;;  %v1358_v48 = vrot.slane %v1339_v62, 7  ;;  %v3954_v62 = vld [vmem:[%s4565_s6] sm:$0xff]  }
 0x1d3   : >> { %v1283_v61 = vpop.f32.mrb[4].mxu0  ;;  %1744 = vrot.lane.b32.xlu1 %v1665_v53, %s2798_s19  ;;  %4750 = vst [vmem:[#allocation4_spill] sm:$0xff] %v3954_v62  ;;  %2664 = vmatpush3.bf16.msra.mxu0 %v3954_v62 }
 0x1d4   : >> { %v3898_v54 = vsel %vm349_vm1, %v1351_v39, %v1358_v48  ;;  %1383 = vst [vmem:[#allocation2 + $0x58] sm:$0x1] %v1358_v48  ;;  %v1334_v1 = vmax.f32 %v1283_v61, 0.0  ;;  %v2641_v40 = vpop.f32.mrb[5].mxu0  ;;  %1684 = vrot.lane.b32.xlu0 %v1657_v51, %s2797_s18  ;;  %2684 = vmatpush3.bf16.msra.mxu1 %v3954_v62 }
 0x1d5   : >> { %v1286_v30 = vpop.f32.mrb[6].mxu0  ;;  %v1587_v24 = vmul.f32 %v1575_v4, %v3898_v54  ;;  %v1844_v42 = vmul.f32 %v1832_v52, %v3898_v54  ;;  %2665 = vmatprep.subr.bf16.mxu0 %v4718_v18  ;;  %2685 = vmatprep.subr.bf16.mxu1 %v4718_v18 }
 0x1d6   : >> { %v1350_v14 = vrot.slane %v1334_v1, 7  ;;  %v1338_v9 = vmax.f32 %v1286_v30, 0.0  ;;  %v2642_v58 = vpop.f32.mrb[7].mxu0 }
 0x1d7   : >> { %1748 = vrot.lane.b32.xlu1 %v1667_v6, %s2798_s19  ;;  %v1614_v43 = vrot.slane %v1587_v24, 1  ;;  %v1871_v58 = vrot.slane %v1844_v42, 2  ;;  %2666 = vmatpush3.bf16.msra.mxu0 %v3974_v56 }
 0x1d8   : >> { %1374 = vst [vmem:[#allocation2 + $0x10] sm:$0xfe] %v1350_v14  ;;  %v1356_v57 = vrot.slane %v1338_v9, 7  ;;  %1742 = vrot.lane.b32.xlu0 %v1654_v33, %s2798_s19  ;;  %2686 = vmatpush3.bf16.msra.mxu1 %v3974_v56 }
 0x1d9   : >> { %v3907_v25 = vld [vmem:[#allocation2 + $0x18] sm:$0xfe]  ;;  %2667 = vmatprep.subr.bf16.mxu0 %v4718_v18  ;;  %2687 = vmatprep.subr.bf16.mxu1 %v4718_v18 }
 0x1da   : >> { %v3911_v20 = vsel %vm349_vm1, %v1350_v14, %v1356_v57  ;;  %1382 = vst [vmem:[#allocation2 + $0x50] sm:$0x1] %v1356_v57  ;;  %v1583_v32 = vmul.f32 %v1575_v4, %v3907_v25  ;;  %v3916_v37 = vld [vmem:[#allocation2 + $0x18] sm:$0xfc]  ;;  %v1910_v14 = vsel %vm872_vm3, %v1908_v21, %v1909_v15  ;;  %v3998_v15 = vld [vmem:[%s4565_s6 + $0x10] sm:$0xff]   ;;  %v1662_v21 = vrot.slane %v3898_v54, 1 }
 0x1db   : >> { %1935 = vrot.lane.b32.xlu1 %v1918_v22, %s2797_s18  ;;  %v3920_v46 = vld [vmem:[#allocation2 + $0x58] sm:$0x1]  ;;  %v1840_v50 = vmul.f32 %v1832_v52, %v3916_v37  ;;  %v1586_v45 = vmul.f32 %v1571_v63, %v3911_v20  ;;  %4757 = vst [vmem:[#allocation28_spill] sm:$0xff] %v3998_v15  ;;  %2668 = vmatpush3.bf16.msra.mxu0 %v3998_v15 }
 0x1dc   : >> { %v3926_v8 = vld [vmem:[#allocation2 + $0x58] sm:$0x3]  ;;  %1746 = vrot.lane.b32.xlu0 %v1657_v51, %s2798_s19  ;;  %v1613_v59 = vrot.slane %v1583_v32, 1  ;;  %v1591_v53 = vmul.f32 %v1575_v4, %v3920_v46  ;;  %2688 = vmatpush3.bf16.msra.mxu1 %v3998_v15 }
 0x1dd   : >> { %v1848_v44 = vmul.f32 %v1832_v52, %v3926_v8  ;;  %v1870_v48 = vrot.slane %v1840_v50, 2  ;;  %v1611_v4 = vrot.slane %v1586_v45, 1  ;;  %2669 = vmatprep.subr.bf16.mxu0 %v4718_v18  ;;  %v4016_v50 = vld [vmem:[%s4565_s6 + $0x18] sm:$0xff]   ;;  %2689 = vmatprep.subr.bf16.mxu1 %v4718_v18  ;;  %v1659_v45 = vrot.slane %v3911_v20, 1 }
 0x1de   : >> { %v1622_v60 = vrot.slane %v1591_v53, 1  ;;  %v3944_v33 = vsel %vm614_vm2, %v1613_v59, %v1614_v43  ;;  %4760 = vst [vmem:[#allocation7_spill] sm:$0xff] %v4016_v50 }
 0x1df   : >> { %1939 = vrot.lane.b32.xlu1 %v1920_v47, %s2797_s18  ;;  %v3939_v6 = vld [vmem:[#allocation2 + $0x10] sm:$0xfe]  ;;  %4749 = vst [vmem:[#allocation6_spill] sm:$0xff] %v3944_v33  ;;  %v1879_v30 = vrot.slane %v1848_v44, 2  ;;  %v3982_v32 = vsel %vm872_vm3, %v1870_v48, %v1871_v58  ;;  %2670 = vmatpush3.bf16.msra.mxu0 %v4016_v50  ;;  %v4059_v48 = vld [vmem:[%s4565_s6 + $0x28] sm:$0xff]  }
 0x1e0   : >> { %v3941_v34 = vld [vmem:[#allocation2 + $0x10] sm:$0xfc]  ;;  %1933 = vrot.lane.b32.xlu0 %v1907_v29, %s2797_s18  ;;  %v1582_v35 = vmul.f32 %v1571_v63, %v3939_v6  ;;  %v3961_v51 = vsel %vm614_vm2, %v1614_v43, %v1622_v60  ;;  %4754 = vst [vmem:[#allocation3_spill] sm:$0xff] %v3982_v32  ;;  %2690 = vmatpush3.bf16.msra.mxu1 %v4016_v50  ;;  %v4022_v43 = vld [vmem:[#allocation2 + $0x18] sm:$0xff]  ;;  %4762 = vst [vmem:[#allocation18_spill] sm:$0xff] %v4059_v48 }
 0x1e1   : >> { %v1839_v39 = vmul.f32 %v1828_v26, %v3941_v34  ;;  %v3956_v23 = vld [vmem:[#allocation2 + $0x50] sm:$0x1]  ;;  %4751 = vst [vmem:[#allocation26_spill] sm:$0xff] %v3961_v51  ;;  %v3990_v52 = vsel %vm872_vm3, %v1871_v58, %v1879_v30  ;;  %2671 = vmatprep.subr.bf16.mxu0 %v4718_v18  ;;  %2691 = vmatprep.subr.bf16.mxu1 %v4718_v18  ;;  %v1912_v30 = vrot.slane %v3911_v20, 2 }
 0x1e2   : >> { %v3958_v61 = vld [vmem:[#allocation2 + $0x50] sm:$0x3]  ;;  %v1610_v1 = vrot.slane %v1582_v35, 1  ;;  %v1590_v40 = vmul.f32 %v1571_v63, %v3956_v23  ;;  %4756 = vst [vmem:[#allocation29_spill] sm:$0xff] %v3990_v52  ;;  %v1668_v60 = vrot.slane %v3956_v23, 1  ;;  %v1923_v35 = vrot.slane %v3926_v8, 2 }
 0x1e3   : >> { %1997 = vrot.lane.b32.xlu1 %v1918_v22, %s2798_s19  ;;  %v1847_v9 = vmul.f32 %v1828_v26, %v3958_v61  ;;  %v1867_v57 = vrot.slane %v1839_v39, 2  ;;  %v1843_v22 = vmul.f32 %v1828_v26, %v3911_v20  ;;  %v1670_v26 = vrot.slane %v3920_v46, 1  ;;  %v4033_v46 = vld [vmem:[%s4565_s6 + $0x20] sm:$0xff]   ;;  %v4040_v44 = vld [vmem:[#allocation2 + $0x10] sm:$0xff] }
 0x1e4   : >> { %1937 = vrot.lane.b32.xlu0 %v1910_v14, %s2797_s18  ;;  %v1620_v12 = vrot.slane %v1590_v40, 1  ;;  %v3978_v24 = vsel %vm614_vm2, %v1610_v1, %v1611_v4  ;;  %4761 = vst [vmem:[#allocation40_spill] sm:$0xff] %v4033_v46  ;;  %2672 = vmatpush3.bf16.msra.mxu0 %v4033_v46  ;;  %v1669_v42 = vsel %vm614_vm2, %v1659_v45, %v1668_v60  ;;  %v1658_v23 = vrot.slane %v3939_v6, 1  ;;  %v4186_v52 = vld [vmem:[%s4563_s4 + $0x12] ss:$4 sm:$0xf] }
 0x1e5   : >> { %4753 = vst [vmem:[#allocation25_spill] sm:$0xff] %v3978_v24  ;;  %v1877_v41 = vrot.slane %v1847_v9, 2  ;;  %v1868_v63 = vrot.slane %v1843_v22, 2  ;;  %2692 = vmatpush3.bf16.msra.mxu1 %v4033_v46  ;;  %2673 = vmatprep.subr.bf16.mxu0 %v4718_v18  ;;  %v1921_v40 = vrot.slane %v3958_v61, 2  ;;  %v1914_v6 = vrot.slane %v3916_v37, 2  ;;  %v4074_v61 = vld [vmem:[%s4565_s6 + $0x30] sm:$0xff]  }
 0x1e6   : >> { %v3987_v19 = vsel %vm614_vm2, %v1611_v4, %v1620_v12  ;;  %2693 = vmatprep.subr.bf16.mxu1 %v4718_v18  ;;  %v1660_v8 = vsel %vm614_vm2, %v1658_v23, %v1659_v45  ;;  %4763 = vst [vmem:[#allocation19_spill] sm:$0xff] %v4074_v61  ;;  %v4083_v37 = vld [vmem:[%s4565_s6 + $0x38] sm:$0xff]   ;;  %v1911_v9 = vrot.slane %v3941_v34, 2 }
 0x1e7   : >> { %4755 = vst [vmem:[#allocation30_spill] sm:$0xff] %v3987_v19  ;;  %2001 = vrot.lane.b32.xlu1 %v1920_v47, %s2798_s19  ;;  %v4002_v59 = vsel %vm872_vm3, %v1867_v57, %v1868_v63  ;;  %v4005_v53 = vsel %vm872_vm3, %v1868_v63, %v1877_v41  ;;  %v1671_v47 = vsel %vm614_vm2, %v1662_v21, %v1670_v26  ;;  %4764 = vst [vmem:[#allocation17_spill] sm:$0xff] %v4083_v37 }
 0x1e8   : >> { %1995 = vrot.lane.b32.xlu0 %v1907_v29, %s2798_s19  ;;  %4758 = vst [vmem:[#allocation16_spill] sm:$0xff] %v4002_v59  ;;  %4759 = vst [vmem:[#allocation15_spill] sm:$0xff] %v4005_v53  ;;  %v1661_v29 = vrot.slane %v3907_v25, 1  ;;  %v1915_v25 = vrot.slane %v3898_v54, 2  ;;  %2674 = vmatpush3.bf16.msra.mxu0 %v4059_v48  ;;  %v1922_v4 = vsel %vm872_vm3, %v1912_v30, %v1921_v40 }
 0x1e9   : >> { %2694 = vmatpush3.bf16.msra.mxu1 %v4059_v48  ;;  %2675 = vmatprep.subr.bf16.mxu0 %v4718_v18  ;;  %v1913_v58 = vsel %vm872_vm3, %v1911_v9, %v1912_v30  ;;  %v2488_v30 = vld [vmem:[%s4563_s4 + $0x1] ss:$4 sm:$0xf]  ;;  %v4181_v53 = vld [vmem:[%s4563_s4 + $0x10] ss:$4 sm:$0xf] }
 0x1ea   : >> { %v1663_v39 = vsel %vm614_vm2, %v1661_v29, %v1662_v21  ;;  %v1924_v1 = vsel %vm872_vm3, %v1915_v25, %v1923_v35  ;;  %2695 = vmatprep.subr.bf16.mxu1 %v4718_v18  ;;  %v1402_v9 = vrot.slane %v2488_v30, %v4745_v2  ;;  %v1410_v32 = vrot.slane %v2488_v30, %v3180_v16 }
 0x1eb   : >> { %1437 = vrot.lane.b32.xlu1 %v3898_v54, %s2797_s18  ;;  %4771 = vst [vmem:[#allocation35_spill] sm:$0xff] %v4181_v53  ;;  %v4191_v24 = vrot.slane %v2488_v30, %v3182_v28 }
 0x1ec   : >> { %1999 = vrot.lane.b32.xlu0 %v1910_v14, %s2798_s19  ;;  %2676 = vmatpush3.bf16.msra.mxu0 %v4074_v61  ;;  %v1916_v14 = vsel %vm872_vm3, %v1914_v6, %v1915_v25  ;;  %v1420_v33 = vmul.f32 %v1402_v9, %v3810_v0  ;;  %v1416_v5 = vmul.f32 %v1402_v9, %v3861_v13 }
 0x1ed   : >> { %2696 = vmatpush3.bf16.msra.mxu1 %v4074_v61  ;;  %2677 = vmatprep.subr.bf16.mxu0 %v4718_v18  ;;  %v1398_v61 = vrot.slane %v2488_v30, %v4746_v36 }
 0x1ee   : >> { %2697 = vmatprep.subr.bf16.mxu1 %v4718_v18 }
 0x1ef   : >> { %1495 = vrot.lane.b32.xlu1 %v3911_v20, %s2798_s19  ;;  %v1419_v30 = vmul.f32 %v1398_v61, %v3825_v10 }
 0x1f0   : >> { %1435 = vrot.lane.b32.xlu0 %v4022_v43, %s2797_s18  ;;  %2678 = vmatpush3.bf16.msra.mxu0 %v4083_v37 }
 0x1f1   : >> { %2698 = vmatpush3.bf16.msra.mxu1 %v4083_v37  ;;  %2703 = vmatprep.subr.bf16.mxu0 %v4718_v18 }
 0x1f2   : >> { %2723 = vmatprep.subr.bf16.mxu1 %v4718_v18  ;;  %v4200_v18 = vld [vmem:[%s4563_s4 + $0x20] ss:$4 sm:$0xf] }
 0x1f3   : >> { %1694 = vrot.lane.b32.xlu1 %v1671_v47, %s2797_s18  ;;  %v4221_v10 = vrot.slane %v4200_v18, %v4745_v2 }
 0x1f4   : >> { %1493 = vrot.lane.b32.xlu0 %v4040_v44, %s2798_s19 }
 0x1f5   : >> { %4774 = vst [vmem:[#allocation37_spill] sm:$0xff] %v4221_v10 }
 0x1f7   : >> { %1752 = vrot.lane.b32.xlu1 %v1669_v42, %s2798_s19 }
 0x1f8   : >> { %1692 = vrot.lane.b32.xlu0 %v1663_v39, %s2797_s18 }
 0x1fb   : >> { %1947 = vrot.lane.b32.xlu1 %v1924_v1, %s2797_s18 }
 0x1fc   : >> { %1750 = vrot.lane.b32.xlu0 %v1660_v8, %s2798_s19 }
 0x1ff   : >> { %2005 = vrot.lane.b32.xlu1 %v1922_v4, %s2798_s19 }
 0x200   : >> { %1945 = vrot.lane.b32.xlu0 %v1916_v14, %s2797_s18 }
 0x203   : >> { %1433 = vrot.lane.b32.xlu1 %v3911_v20, %s2797_s18 }
 0x204   : >> { %2003 = vrot.lane.b32.xlu0 %v1913_v58, %s2798_s19 }
 0x207   : >> { %1499 = vrot.lane.b32.xlu1 %v3898_v54, %s2798_s19 }
 0x208   : >> { %1431 = vrot.lane.b32.xlu0 %v4040_v44, %s2797_s18 }
 0x20b   : >> { %1690 = vrot.lane.b32.xlu1 %v1669_v42, %s2797_s18 }
 0x20c   : >> { %1497 = vrot.lane.b32.xlu0 %v4022_v43, %s2798_s19 }
 0x20f   : >> { %1756 = vrot.lane.b32.xlu1 %v1671_v47, %s2798_s19 }
 0x210   : >> { %1688 = vrot.lane.b32.xlu0 %v1660_v8, %s2797_s18 }
 0x213   : >> { %1943 = vrot.lane.b32.xlu1 %v1922_v4, %s2797_s18  ;;  %v4155_v4 = vld [vmem:[%s4563_s4] ss:$4 sm:$0xf] }
 0x214   : >> { %1754 = vrot.lane.b32.xlu0 %v1663_v39, %s2798_s19  ;;  %v1456_v48 = vrot.slane %v4155_v4, %v4745_v2  ;;  %v1452_v46 = vrot.slane %v4155_v4, %v4746_v36 }
 0x217   : >> { %2009 = vrot.lane.b32.xlu1 %v1924_v1, %s2798_s19 }
 0x218   : >> { %1941 = vrot.lane.b32.xlu0 %v1913_v58, %s2797_s18  ;;  %v4163_v58 = vld [vmem:[%s4563_s4 + $0x2] ss:$4 sm:$0xf] }
 0x219   : >> { %4769 = vst [vmem:[#allocation9_spill] sm:$0xff] %v4163_v58  ;;  %v1515_v50 = vrot.slane %v4163_v58, %v4746_v36  ;;  %v1519_v0 = vrot.slane %v4163_v58, %v4745_v2 }
 0x21c   : >> { %2007 = vrot.lane.b32.xlu0 %v1916_v14, %s2798_s19 }
 0x22d   : >> { %v1426_v34 = vpop.permute.xlu1 %1425 }
 0x231   : >> { %v4113_v12 = vpop.permute.xlu1 %1429 }
 0x232   : >> { %4765 = vst [vmem:[#allocation20_spill] sm:$0xff] %v4113_v12  ;;  %v1424_v57 = vpop.permute.xlu0 %1423  ;;  %v1444_v59 = vsel %vm443_vm5, %v1426_v34, %v4113_v12 }
 0x233   : >> { %v1474_v62 = vmul.f32 %v1456_v48, %v1444_v59 }
 0x235   : >> { %v4115_v22 = vpop.permute.xlu1 %1487 }
 0x236   : >> { %4766 = vst [vmem:[#allocation8_spill] sm:$0xff] %v4115_v22  ;;  %v4117_v41 = vpop.permute.xlu0 %1427 }
 0x237   : >> { %4767 = vst [vmem:[#allocation34_spill] sm:$0xff] %v4117_v41  ;;  %v1443_v59 = vsel %vm443_vm5, %v1424_v57, %v4117_v41  ;;  %v1709_v41 = vrot.slane %v4181_v53, %v4746_v36 }
 0x238   : >> { %v1470_v16 = vmul.f32 %v1456_v48, %v1443_v59 }
 0x239   : >> { %v1492_v63 = vpop.permute.xlu1 %1491 }
 0x23a   : >> { %v4119_v26 = vpop.permute.xlu0 %1485  ;;  %v1506_v56 = vsel %vm506_vm6, %v4115_v22, %v1492_v63  ;;  %v1415_v22 = vmul.f32 %v1398_v61, %v3840_v38  ;;  %v4226_v38 = vld [vmem:[%s4563_s4 + $0x22] ss:$4 sm:$0xf] }
 0x23b   : >> { %4768 = vst [vmem:[#allocation27_spill] sm:$0xff] %v4119_v26 }
 0x23d   : >> { %v4121_v21 = vpop.permute.xlu1 %1682 }
 0x23e   : >> { %v4123_v47 = vpop.permute.xlu0 %1489 }
 0x23f   : >> { %v1505_v61 = vsel %vm506_vm6, %v4119_v26, %v4123_v47  ;;  %v4248_v26 = vmul.f32 %v1410_v32, %v4022_v43 }
 0x241   : >> { %v4125_v60 = vpop.permute.xlu1 %1686 }
 0x242   : >> { %v4127_v29 = vpop.permute.xlu0 %1680 }
 0x245   : >> { %v4129_v45 = vpop.permute.xlu1 %1744 }
 0x246   : >> { %v4131_v42 = vpop.permute.xlu0 %1684 }
 0x249   : >> { %v4133_v35 = vpop.permute.xlu1 %1748 }
 0x24a   : >> { %v4135_v39 = vpop.permute.xlu0 %1742  ;;  %v1763_v43 = vsel %vm506_vm6, %v4129_v45, %v4133_v35 }
 0x24d   : >> { %v4137_v23 = vpop.permute.xlu1 %1935 }
 0x24e   : >> { %v4139_v25 = vpop.permute.xlu0 %1746 }
 0x251   : >> { %v4141_v1 = vpop.permute.xlu1 %1939 }
 0x252   : >> { %v4143_v40 = vpop.permute.xlu0 %1933 }
 0x255   : >> { %v4145_v8 = vpop.permute.xlu1 %1997 }
 0x256   : >> { %v4147_v6 = vpop.permute.xlu0 %1937 }
 0x259   : >> { %v4157_v14 = vpop.permute.xlu1 %2001 }
 0x25a   : >> { %v4165_v37 = vpop.permute.xlu0 %1995 }
 0x25b   : >> { %4770 = vst [vmem:[#allocation32_spill] sm:$0xff] %v4165_v37  ;;  %v1713_v37 = vrot.slane %v4181_v53, %v4745_v2  ;;  %v1532_v53 = vmul.f32 %v1515_v50, %v1505_v61 }
 0x25d   : >> { %v4188_v15 = vpop.permute.xlu1 %1437 }
 0x25e   : >> { %4772 = vst [vmem:[#allocation36_spill] sm:$0xff] %v4188_v15  ;;  %v4202_v19 = vpop.permute.xlu0 %1999  ;;  %v1446_v51 = vsel %vm443_vm5, %v4188_v15, %v1426_v34  ;;  %v1536_v34 = vmul.f32 %v1515_v50, %v1506_v56  ;;  %v4242_v15 = vmul.f32 %v1410_v32, %v3898_v54  ;;  %v1701_v32 = vsel %vm443_vm5, %v4121_v21, %v4125_v60 }
 0x25f   : >> { %4773 = vst [vmem:[#allocation38_spill] sm:$0xff] %v4202_v19  ;;  %v1473_v12 = vmul.f32 %v1452_v46, %v1446_v51  ;;  %v1772_v19 = vrot.slane %v4186_v52, %v4746_v36 }
 0x261   : >> { %v1481_v13 = vadd.f32 %v1473_v12, %v1419_v30  ;;  %v4228_v51 = vpop.permute.xlu1 %1495  ;;  %v1482_v12 = vadd.f32 %v1474_v62, %v1420_v33  ;;  %v4259_v62 = vmul.f32 %v4191_v24, %v3911_v20 }
 0x262   : >> { %4775 = vst [vmem:[#allocation39_spill] sm:$0xff] %v4228_v51  ;;  %v4234_v9 = vpop.permute.xlu0 %1435  ;;  %v1504_v56 = vsel %vm506_vm6, %v1492_v63, %v4228_v51  ;;  %v4252_v63 = vrot.slane %v4226_v38, %v4746_v36 }
 0x263   : >> { %v1445_v30 = vsel %vm443_vm5, %v4234_v9, %v1424_v57  ;;  %v1544_v58 = vadd.f32 %v1536_v34, %v1481_v13  ;;  %v1537_v17 = vmul.f32 %v1519_v0, %v1504_v56  ;;  %v1776_v57 = vrot.slane %v4186_v52, %v4745_v2 }
 0x264   : >> { %v1469_v51 = vmul.f32 %v1452_v46, %v1445_v30  ;;  %v1962_v34 = vrot.slane %v4200_v18, %v4746_v36  ;;  %v1731_v13 = vmul.f32 %v1713_v37, %v1701_v32  ;;  %v4312_v32 = vmul.f32 %v4191_v24, %v4040_v44 }
 0x265   : >> { %v1545_v10 = vadd.f32 %v1537_v17, %v1482_v12  ;;  %v1636_v54 = vadd.f32 %v3872_v27, %v1544_v58  ;;  %v4255_v33 = vpop.permute.xlu1 %1694  ;;  %v1478_v58 = vadd.f32 %v1470_v16, %v1416_v5  ;;  %v1762_v16 = vsel %vm506_vm6, %v4135_v39, %v4139_v25 }
 0x266   : >> { %v1477_v50 = vadd.f32 %v1469_v51, %v1415_v22  ;;  %v4269_v17 = vpop.permute.xlu0 %1493  ;;  %v1703_v27 = vsel %vm443_vm5, %v4255_v33, %v4121_v21  ;;  %v1700_v21 = vsel %vm443_vm5, %v4127_v29, %v4131_v42  ;;  %v1793_v51 = vmul.f32 %v1772_v19, %v1763_v43 }
 0x267   : >> { %v1503_v20 = vsel %vm506_vm6, %v4123_v47, %v4269_v17  ;;  %v1637_v46 = vadd.f32 %v3847_v7, %v1545_v10  ;;  %v1730_v48 = vmul.f32 %v1709_v41, %v1703_v27  ;;  %v4293_v7 = vld [vmem:[%s4564_s5] sm:$0xf]  ;;  %v1727_v27 = vmul.f32 %v1713_v37, %v1700_v21 }
 0x268   : >> { %v1540_v22 = vadd.f32 %v1532_v53, %v1477_v50  ;;  %v1533_v59 = vmul.f32 %v1519_v0, %v1503_v20  ;;  %v2063_v50 = vrot.slane %v4293_v7, %v4746_v36  ;;  %v1954_v24 = vsel %vm443_vm5, %v4137_v23, %v4141_v1 }
 0x269   : >> { %v1738_v47 = vadd.f32 %v1730_v48, %v1636_v54  ;;  %v4288_v61 = vpop.permute.xlu1 %1752  ;;  %v1739_v30 = vadd.f32 %v1731_v13, %v1637_v46  ;;  %v1789_v46 = vmul.f32 %v1772_v19, %v1762_v16  ;;  %v1460_v13 = vrot.slane %v4155_v4, %v3182_v28 }
 0x26a   : >> { %v1541_v5 = vadd.f32 %v1533_v59, %v1478_v58  ;;  %v1632_v53 = vadd.f32 %v3869_v55, %v1540_v22  ;;  %v4300_v0 = vpop.permute.xlu0 %1692  ;;  %v1761_v10 = vsel %vm506_vm6, %v4133_v35, %v4288_v61 }
 0x26b   : >> { %v1702_v56 = vsel %vm443_vm5, %v4300_v0, %v4127_v29  ;;  %v1801_v12 = vadd.f32 %v1793_v51, %v1738_v47  ;;  %v1794_v54 = vmul.f32 %v1776_v57, %v1761_v10  ;;  %v2029_v29 = vrot.slane %v4226_v38, %v4745_v2  ;;  %v4776_v51 = vld [vmem:[#allocation37_spill] sm:$0xff] }
 0x26c   : >> { %v1633_v55 = vadd.f32 %v3837_v49, %v1541_v5  ;;  %v1726_v43 = vmul.f32 %v1709_v41, %v1702_v56  ;;  %v1984_v47 = vmul.f32 %v4776_v51, %v1954_v24 }
 0x26d   : >> { %v1802_v35 = vadd.f32 %v1794_v54, %v1739_v30  ;;  %v1893_v20 = vadd.f32 %v3880_v11, %v1801_v12  ;;  %v4318_v48 = vpop.permute.xlu1 %1947  ;;  %v2016_v11 = vsel %vm506_vm6, %v4145_v8, %v4157_v14  ;;  %v4779_v54 = vld [vmem:[#allocation38_spill] sm:$0xff] }
 0x26e   : >> { %v1734_v49 = vadd.f32 %v1726_v43, %v1632_v53  ;;  %v4326_v44 = vpop.permute.xlu0 %1750  ;;  %v1956_v37 = vsel %vm443_vm5, %v4318_v48, %v4137_v23  ;;  %v1735_v59 = vadd.f32 %v1727_v27, %v1633_v55  ;;  %v1953_v23 = vsel %vm443_vm5, %v4143_v40, %v4147_v6  ;;  %v4780_v55 = vld [vmem:[#allocation32_spill] sm:$0xff] }
 0x26f   : >> { %v1760_v19 = vsel %vm506_vm6, %v4139_v25, %v4326_v44  ;;  %v1894_v41 = vadd.f32 %v3858_v3, %v1802_v35  ;;  %v1983_v58 = vmul.f32 %v1962_v34, %v1956_v37  ;;  %v4777_v25 = vld [vmem:[#allocation23_spill] sm:$0xff]  ;;  %v2046_v53 = vmul.f32 %v4252_v63, %v2016_v11 }
 0x270   : >> { %v1797_v22 = vadd.f32 %v1789_v46, %v1734_v49  ;;  %v1790_v21 = vmul.f32 %v1776_v57, %v1760_v19  ;;  %v1464_v3 = vrot.slane %v4155_v4, %v4777_v25  ;;  %v4778_v57 = vld [vmem:[#allocation31_spill] sm:$0xff]  ;;  %v2015_v43 = vsel %vm506_vm6, %v4780_v55, %v4779_v54 }
 0x271   : >> { %v1991_v16 = vadd.f32 %v1983_v58, %v1893_v20  ;;  %v4348_v5 = vpop.permute.xlu1 %2005  ;;  %v1992_v27 = vadd.f32 %v1984_v47, %v1894_v41  ;;  %v4781_v20 = vld [vmem:[#allocation24_spill] sm:$0xff]  ;;  %v2067_v49 = vrot.slane %v4293_v7, %v4745_v2  ;;  %v1980_v11 = vmul.f32 %v4776_v51, %v1953_v23 }
 0x272   : >> { %v1798_v10 = vadd.f32 %v1790_v21, %v1735_v59  ;;  %v1889_v56 = vadd.f32 %v4778_v57, %v1797_v22  ;;  %v4354_v12 = vpop.permute.xlu0 %1945  ;;  %v2014_v30 = vsel %vm506_vm6, %v4157_v14, %v4348_v5  ;;  %v4782_v14 = vld [vmem:[#allocation9_spill] sm:$0xff] }
 0x273   : >> { %v1955_v4 = vsel %vm443_vm5, %v4354_v12, %v4143_v40  ;;  %v2047_v35 = vmul.f32 %v2029_v29, %v2014_v30  ;;  %v1523_v37 = vrot.slane %v4782_v14, %v3182_v28  ;;  %v2054_v19 = vadd.f32 %v2046_v53, %v1991_v16 }
 0x274   : >> { %v1890_v46 = vadd.f32 %v4781_v20, %v1798_v10  ;;  %v1979_v24 = vmul.f32 %v1962_v34, %v1955_v4  ;;  %v1527_v59 = vrot.slane %v4782_v14, %v4777_v25  ;;  %v2042_v40 = vmul.f32 %v4252_v63, %v2015_v43  ;;  %v4783_v34 = vld [vmem:[#allocation36_spill] sm:$0xff]  ;;  %v4785_v63 = vld [vmem:[#allocation35_spill] sm:$0xff] }
 0x275   : >> { %v2055_v58 = vadd.f32 %v2047_v35, %v1992_v27  ;;  %v1434_v22 = vpop.permute.xlu1 %1433  ;;  %v4784_v10 = vld [vmem:[#allocation20_spill] sm:$0xff]  ;;  %v4391_v53 = vrot.slane %v4785_v63, %v3182_v28  ;;  %v1721_v4 = vrot.slane %v4785_v63, %v4777_v25  ;;  %v2084_v27 = vadd.f32 %v2063_v50, %v2054_v19 }
 0x276   : >> { %v1987_v41 = vadd.f32 %v1979_v24, %v1889_v56  ;;  %v4377_v21 = vpop.permute.xlu0 %2003  ;;  %v1440_v47 = vsel %vm443_vm5, %v1434_v22, %v4783_v34  ;;  %v1442_v57 = vsel %vm443_vm5, %v4784_v10, %v1434_v22  ;;  %v1988_v30 = vadd.f32 %v1980_v11, %v1890_v46  ;;  %v4788_v11 = vld [vmem:[#allocation34_spill] sm:$0xff] }
 0x277   : >> { %v2013_v23 = vsel %vm506_vm6, %v4779_v54, %v4377_v21  ;;  %v1475_v51 = vmul.f32 %v1460_v13, %v1442_v57  ;;  %v1476_v16 = vmul.f32 %v1464_v3, %v1440_v47  ;;  %v2085_v35 = vadd.f32 %v2067_v49, %v2055_v58  ;;  %v4786_v47 = vld [vmem:[#allocation39_spill] sm:$0xff] }
 0x278   : >> { %v2050_v56 = vadd.f32 %v2042_v40, %v1987_v41  ;;  %v2043_v43 = vmul.f32 %v2029_v29, %v2013_v23  ;;  %v4787_v40 = vld [vmem:[#allocation8_spill] sm:$0xff]  ;;  %v1780_v63 = vrot.slane %v4186_v52, %v3182_v28 }
 0x279   : >> { %v1483_v20 = vadd.f32 %v1475_v51, %v4259_v62  ;;  %v1484_v24 = vadd.f32 %v1476_v16, %v4242_v15  ;;  %v1500_v14 = vpop.permute.xlu1 %1499 }
 0x27a   : >> { %v2080_v54 = vadd.f32 %v2063_v50, %v2050_v56  ;;  %v2051_v22 = vadd.f32 %v2043_v43, %v1988_v30  ;;  %v1432_v34 = vpop.permute.xlu0 %1431  ;;  %v1502_v10 = vsel %vm506_vm6, %v4786_v47, %v1500_v14  ;;  %v1508_v29 = vsel %vm506_vm6, %v1500_v14, %v4787_v40 }
 0x27b   : >> { %v1439_v46 = vsel %vm443_vm5, %v1432_v34, %v4234_v9  ;;  %v1441_v15 = vsel %vm443_vm5, %v4788_v11, %v1432_v34  ;;  %v1538_v62 = vmul.f32 %v1523_v37, %v1502_v10  ;;  %v1539_v50 = vmul.f32 %v1527_v59, %v1508_v29 }
 0x27c   : >> { %v2081_v19 = vadd.f32 %v2067_v49, %v2051_v22  ;;  %v1471_v58 = vmul.f32 %v1460_v13, %v1441_v15  ;;  %v1472_v41 = vmul.f32 %v1464_v3, %v1439_v46  ;;  %v2104_v57 = vpack.c.bf16 %v2084_v27, %v2080_v54  ;;  %v4789_v49 = vld [vmem:[#allocation27_spill] sm:$0xff] }
 0x27d   : >> { %v1546_v23 = vadd.f32 %v1538_v62, %v1483_v20  ;;  %v1547_v51 = vadd.f32 %v1539_v50, %v1484_v24  ;;  %v1691_v16 = vpop.permute.xlu1 %1690  ;;  %v1784_v56 = vrot.slane %v4186_v52, %v4777_v25  ;;  %v4790_v52 = vld [vmem:[#allocation4_spill] sm:$0xff]  ;;  %v4793_v22 = vmov 0.0   ;;  %v4794_v62 = vld [vmem:[#allocation5_spill] sm:$0xff] }
 0x27e   : >> { %v1479_v9 = vadd.f32 %v1471_v58, %v4312_v32  ;;  %v1480_v30 = vadd.f32 %v1472_v41, %v4248_v26  ;;  %v1498_v43 = vpop.permute.xlu0 %1497  ;;  %2680 = vmatmul.mubr.bf16.vlgmr.msra.gmra.mrb[8].mxu0 %v2104_v57  ;;  %v2194_v14 = vpack.c.bf16 %v2085_v35, %v2081_v19  ;;  %v1697_v13 = vsel %vm443_vm5, %v1691_v16, %v4255_v33  ;;  %v4791_v32 = vld [vmem:[#allocation26_spill] sm:$0xff]  ;;  %v4796_v58 = vld [vmem:[#allocation25_spill] sm:$0xff] }
 0x27f   : >> { %v1501_v3 = vsel %vm506_vm6, %v4269_v17, %v1498_v43  ;;  %v1507_v27 = vsel %vm506_vm6, %v1498_v43, %v4789_v49  ;;  %2704 = vmatpush3.bf16.msra.mxu0 %v4790_v52  ;;  %v1639_v20 = vadd.f32 %v4791_v32, %v1547_v51  ;;  %v4792_v26 = vld [vmem:[#allocation30_spill] sm:$0xff]  ;;  %v1699_v33 = vsel %vm443_vm5, %v4125_v60, %v1691_v16  ;;  %v4799_v32 = vld [vmem:[#allocation15_spill] sm:$0xff] }
 0x280   : >> { %v1638_v24 = vadd.f32 %v4792_v26, %v1546_v23  ;;  %v1534_v54 = vmul.f32 %v1523_v37, %v1501_v3  ;;  %v1535_v35 = vmul.f32 %v1527_v59, %v1507_v27  ;;  %2700 = vmatmul.mubr.bf16.vlgmr.msra.gmra.mrb[8].mxu1 %v2194_v14  ;;  %2705 = vmatprep.subr.bf16.mxu0 %v4793_v22  ;;  %v4795_v19 = vld [vmem:[#allocation6_spill] sm:$0xff]  ;;  %v4797_v3 = vld [vmem:[#allocation28_spill] sm:$0xff] }
 0x281   : >> { %2724 = vmatpush3.bf16.msra.mxu1 %v4790_v52  ;;  %v1732_v17 = vmul.f32 %v4391_v53, %v1699_v33  ;;  %v1733_v34 = vmul.f32 %v1721_v4, %v1697_v13  ;;  %v1757_v47 = vpop.permute.xlu1 %1756  ;;  %v1970_v10 = vrot.slane %v4200_v18, %v3182_v28  ;;  %2719 = vmatprep.mubr.msk.bf16.mxu0 %vm2800_vm4, %v4793_v22  ;;  %v4798_v52 = vld [vmem:[#allocation29_spill] sm:$0xff] }
 0x282   : >> { %v1542_v37 = vadd.f32 %v1534_v54, %v1479_v9  ;;  %v1543_v59 = vadd.f32 %v1535_v35, %v1480_v30  ;;  %v1689_v40 = vpop.permute.xlu0 %1688  ;;  %2725 = vmatprep.subr.bf16.mxu1 %v4793_v22  ;;  %v1759_v60 = vsel %vm506_vm6, %v4288_v61, %v1757_v47  ;;  %v1765_v29 = vsel %vm506_vm6, %v1757_v47, %v4129_v45  ;;  %v4801_v47 = vld [vmem:[#allocation3_spill] sm:$0xff] }
 0x283   : >> { %v1696_v46 = vsel %vm443_vm5, %v1689_v40, %v4300_v0  ;;  %v1698_v11 = vsel %vm443_vm5, %v4131_v42, %v1689_v40  ;;  %v1740_v15 = vadd.f32 %v1732_v17, %v1638_v24  ;;  %2706 = vmatpush3.bf16.msra.mxu0 %v4794_v62  ;;  %v1974_v50 = vrot.slane %v4200_v18, %v4777_v25 }
 0x284   : >> { %v1635_v61 = vadd.f32 %v4795_v19, %v1543_v59  ;;  %v1634_v41 = vadd.f32 %v4796_v58, %v1542_v37  ;;  %v1728_v45 = vmul.f32 %v4391_v53, %v1698_v11  ;;  %v1729_v57 = vmul.f32 %v1721_v4, %v1696_v46  ;;  %2707 = vmatprep.subr.bf16.mxu0 %v4793_v22  ;;  %v4802_v59 = vld [vmem:[#allocation16_spill] sm:$0xff] }
 0x285   : >> { %v1741_v0 = vadd.f32 %v1733_v34, %v1639_v20  ;;  %2726 = vmatpush3.bf16.msra.mxu1 %v4794_v62  ;;  %v1795_v23 = vmul.f32 %v1780_v63, %v1759_v60  ;;  %v1796_v42 = vmul.f32 %v1784_v56, %v1765_v29  ;;  %v1944_v51 = vpop.permute.xlu1 %1943  ;;  %2739 = vmatprep.mubr.msk.bf16.mxu1 %vm2800_vm4, %v4793_v22  ;;  %v4800_v34 = vld [vmem:[#allocation7_spill] sm:$0xff] }
 0x286   : >> { %v1736_v16 = vadd.f32 %v1728_v45, %v1634_v41  ;;  %v1755_v18 = vpop.permute.xlu0 %1754  ;;  %2727 = vmatprep.subr.bf16.mxu1 %v4793_v22  ;;  %v1950_v53 = vsel %vm443_vm5, %v1944_v51, %v4318_v48  ;;  %v1952_v4 = vsel %vm443_vm5, %v4141_v1, %v1944_v51  ;;  %v2033_v9 = vrot.slane %v4226_v38, %v3182_v28 }
 0x287   : >> { %v1758_v30 = vsel %vm506_vm6, %v4326_v44, %v1755_v18  ;;  %v1764_v43 = vsel %vm506_vm6, %v1755_v18, %v4135_v39  ;;  %v1803_v14 = vadd.f32 %v1795_v23, %v1740_v15  ;;  %v1804_v13 = vadd.f32 %v1796_v42, %v1741_v0  ;;  %2708 = vmatpush3.bf16.msra.mxu0 %v4797_v3  ;;  %v4804_v23 = vld [vmem:[#allocation18_spill] sm:$0xff]  ;;  %v4805_v18 = vld [vmem:[#allocation19_spill] sm:$0xff] }
 0x288   : >> { %v1737_v48 = vadd.f32 %v1729_v57, %v1635_v61  ;;  %v1791_v49 = vmul.f32 %v1780_v63, %v1758_v30  ;;  %v1792_v27 = vmul.f32 %v1784_v56, %v1764_v43  ;;  %2709 = vmatprep.subr.bf16.mxu0 %v4793_v22  ;;  %v2037_v1 = vrot.slane %v4226_v38, %v4777_v25  ;;  %v4803_v61 = vld [vmem:[#allocation40_spill] sm:$0xff] }
 0x289   : >> { %2728 = vmatpush3.bf16.msra.mxu1 %v4797_v3  ;;  %v1896_v44 = vadd.f32 %v4798_v52, %v1804_v13  ;;  %v1895_v20 = vadd.f32 %v4799_v32, %v1803_v14  ;;  %v1985_v26 = vmul.f32 %v1970_v10, %v1952_v4  ;;  %v1986_v39 = vmul.f32 %v1974_v50, %v1950_v53  ;;  %v2010_v24 = vpop.permute.xlu1 %2009  ;;  %v4806_v53 = vld [vmem:[#allocation17_spill] sm:$0xff]  ;;  %v2320_v4 = vld [vmem:[%s4566_s7] sm:$0xf] }
 0x28a   : >> { %v1799_v54 = vadd.f32 %v1791_v49, %v1736_v16  ;;  %v1800_v35 = vadd.f32 %v1792_v27, %v1737_v48  ;;  %v1942_v33 = vpop.permute.xlu0 %1941  ;;  %2729 = vmatprep.subr.bf16.mxu1 %v4793_v22  ;;  %v2012_v63 = vsel %vm506_vm6, %v4348_v5, %v2010_v24  ;;  %v2018_v38 = vsel %vm506_vm6, %v2010_v24, %v4145_v8  ;;  %v2350_v14 = vld [vmem:[%s2874_s17] sm:$0xff]  ;;  %v2351_v27 = vld [vmem:[%s2874_s17 + $0x8] sm:$0xff] }
 0x28b   : >> { %v1949_v56 = vsel %vm443_vm5, %v1942_v33, %v4354_v12  ;;  %v1951_v17 = vsel %vm443_vm5, %v4147_v6, %v1942_v33  ;;  %2710 = vmatpush3.bf16.msra.mxu0 %v4800_v34  ;;  %v2048_v8 = vmul.f32 %v2033_v9, %v2012_v63  ;;  %v2049_v29 = vmul.f32 %v2037_v1, %v2018_v38  ;;  %v2354_v48 = vld [vmem:[%s2874_s17 + $0x20] sm:$0xff] }
 0x28c   : >> { %v1892_v37 = vadd.f32 %v4801_v47, %v1800_v35  ;;  %v1891_v40 = vadd.f32 %v4802_v59, %v1799_v54  ;;  %v1981_v60 = vmul.f32 %v1970_v10, %v1951_v17  ;;  %v1982_v5 = vmul.f32 %v1974_v50, %v1949_v56  ;;  %2711 = vmatprep.subr.bf16.mxu0 %v4793_v22 }
 0x28d   : >> { %2730 = vmatpush3.bf16.msra.mxu1 %v4800_v34  ;;  %v1993_v46 = vadd.f32 %v1985_v26, %v1895_v20  ;;  %v1994_v12 = vadd.f32 %v1986_v39, %v1896_v44  ;;  %v2071_v11 = vrot.slane %v4293_v7, %v3182_v28  ;;  %v2075_v6 = vrot.slane %v4293_v7, %v4777_v25 }
 0x28e   : >> { %v2008_v15 = vpop.permute.xlu0 %2007  ;;  %2731 = vmatprep.subr.bf16.mxu1 %v4793_v22  ;;  %v1989_v62 = vadd.f32 %v1981_v60, %v1891_v40  ;;  %v1990_v10 = vadd.f32 %v1982_v5, %v1892_v37  ;;  %v2329_v30 = vrot.slane %v2320_v4, %v4745_v2  ;;  %v2333_v17 = vrot.slane %v2320_v4, %v3182_v28  ;;  %v2352_v37 = vld [vmem:[%s2874_s17 + $0x10] sm:$0xff] }
 0x28f   : >> { %v2011_v50 = vsel %vm506_vm6, %v4377_v21, %v2008_v15  ;;  %v2017_v19 = vsel %vm506_vm6, %v2008_v15, %v4780_v55  ;;  %2712 = vmatpush3.bf16.msra.mxu0 %v4803_v61  ;;  %v2056_v45 = vadd.f32 %v2048_v8, %v1993_v46  ;;  %v2057_v57 = vadd.f32 %v2049_v29, %v1994_v12  ;;  %v2356_v5 = vld [vmem:[%s2874_s17 + $0x30] sm:$0xff]  ;;  %v2353_v29 = vld [vmem:[%s2874_s17 + $0x18] sm:$0xff] }
 0x290   : >> { %v2044_v58 = vmul.f32 %v2033_v9, %v2011_v50  ;;  %v2045_v41 = vmul.f32 %v2037_v1, %v2017_v19  ;;  %2713 = vmatprep.subr.bf16.mxu0 %v4793_v22  ;;  %v2325_v9 = vrot.slane %v2320_v4, %v4746_v36  ;;  %v2355_v36 = vld [vmem:[%s2874_s17 + $0x28] sm:$0xff]  ;;  %v2337_v34 = vrot.slane %v2320_v4, %v4777_v25 }
 0x291   : >> { %2732 = vmatpush3.bf16.msra.mxu1 %v4803_v61  ;;  %v2086_v31 = vadd.f32 %v2071_v11, %v2056_v45  ;;  %v2087_v55 = vadd.f32 %v2075_v6, %v2057_v57 }
 0x292   : >> { %v2052_v7 = vadd.f32 %v2044_v58, %v1989_v62  ;;  %v2053_v0 = vadd.f32 %v2045_v41, %v1990_v10  ;;  %2733 = vmatprep.subr.bf16.mxu1 %v4793_v22  ;;  %v2357_v62 = vld [vmem:[%s2874_s17 + $0x38] sm:$0xff] }
 0x293   : >> { %2714 = vmatpush3.bf16.msra.mxu0 %v4804_v23 }
 0x294   : >> { %v2082_v21 = vadd.f32 %v2071_v11, %v2052_v7  ;;  %v2083_v42 = vadd.f32 %v2075_v6, %v2053_v0  ;;  %2715 = vmatprep.subr.bf16.mxu0 %v4793_v22 }
 0x295   : >> { %2734 = vmatpush3.bf16.msra.mxu1 %v4804_v23 }
 0x296   : >> { %2735 = vmatprep.subr.bf16.mxu1 %v4793_v22  ;;  %v2236_v51 = vpack.c.bf16 %v2086_v31, %v2082_v21  ;;  %v2278_v16 = vpack.c.bf16 %v2087_v55, %v2083_v42 }
 0x297   : >> { %2716 = vmatpush3.bf16.msra.mxu0 %v4805_v18 }
 0x298   : >> { %2717 = vmatprep.subr.bf16.mxu0 %v4793_v22 }
 0x299   : >> { %2736 = vmatpush3.bf16.msra.mxu1 %v4805_v18 }
 0x29a   : >> { %2737 = vmatprep.subr.bf16.mxu1 %v4793_v22 }
 0x29b   : >> { %2718 = vmatpush3.bf16.msra.mxu0 %v4806_v53 }
 0x29d   : >> { %2738 = vmatpush3.bf16.msra.mxu1 %v4806_v53 }
 0x29e   : >> { %2720 = vmatmul.mubr.bf16.vlgmr.msra.gmra.mrb[12].mxu0 %v2236_v51 }
 0x2a0   : >> { %2740 = vmatmul.mubr.bf16.vlgmr.msra.gmra.mrb[12].mxu1 %v2278_v16 }
 0x351   : >> { %v2187_v43 = vpop.f32.mrb[8].mxu0 }
 0x352   : >> { %v2342_v22 = vadd.f32 %v2325_v9, %v2187_v43  ;;  %v2681_v13 = vpop.f32.mrb[9].mxu0 }
 0x353   : >> { %v2190_v3 = vpop.f32.mrb[10].mxu0  ;;  %v2229_v49 = vpop.f32.mrb[8].mxu1 }
 0x354   : >> { %v2358_v1 = vadd.f32 %v2350_v14, %v2342_v22  ;;  %v2346_v52 = vadd.f32 %v2325_v9, %v2190_v3  ;;  %v2343_v44 = vadd.f32 %v2329_v30, %v2229_v49  ;;  %v2682_v32 = vpop.f32.mrb[11].mxu0  ;;  %v2701_v20 = vpop.f32.mrb[9].mxu1 }
 0x355   : >> { %v2232_v2 = vpop.f32.mrb[10].mxu1 }
 0x356   : >> { %v2366_v26 = vmax.f32 %v2358_v1, 0.0  ;;  %v2362_v39 = vadd.f32 %v2354_v48, %v2346_v52  ;;  %v2359_v24 = vadd.f32 %v2351_v27, %v2343_v44  ;;  %v2347_v54 = vadd.f32 %v2329_v30, %v2232_v2  ;;  %v2702_v35 = vpop.f32.mrb[11].mxu1 }
 0x358   : >> { %2376 = vst [vmem:[%s4536_s20] sm:$0xff] %v2366_v26  ;;  %v2370_v33 = vmax.f32 %v2362_v39, 0.0  ;;  %v2367_v63 = vmax.f32 %v2359_v24, 0.0  ;;  %v2363_v38 = vadd.f32 %v2355_v36, %v2347_v54 }
 0x35a   : >> { %2380 = vst [vmem:[%s4536_s20 + $0x20] sm:$0xff] %v2370_v33  ;;  %2377 = vst [vmem:[%s4536_s20 + $0x8] sm:$0xff] %v2367_v63  ;;  %v2371_v56 = vmax.f32 %v2363_v38, 0.0 }
 0x35c   : >> { %2381 = vst [vmem:[%s4536_s20 + $0x28] sm:$0xff] %v2371_v56 }
 0x371   : >> { %v2271_v47 = vpop.f32.mrb[12].mxu0 }
 0x372   : >> { %v2344_v59 = vadd.f32 %v2333_v17, %v2271_v47  ;;  %v2721_v40 = vpop.f32.mrb[13].mxu0 }
 0x373   : >> { %v2274_v60 = vpop.f32.mrb[14].mxu0  ;;  %v2313_v8 = vpop.f32.mrb[12].mxu1 }
 0x374   : >> { %v2360_v46 = vadd.f32 %v2352_v37, %v2344_v59  ;;  %v2348_v12 = vadd.f32 %v2333_v17, %v2274_v60  ;;  %v2345_v11 = vadd.f32 %v2337_v34, %v2313_v8  ;;  %v2722_v6 = vpop.f32.mrb[15].mxu0  ;;  %v2741_v28 = vpop.f32.mrb[13].mxu1 }
 0x375   : >> { %v2316_v15 = vpop.f32.mrb[14].mxu1 }
 0x376   : >> { %v2368_v25 = vmax.f32 %v2360_v46, 0.0  ;;  %v2364_v10 = vadd.f32 %v2356_v5, %v2348_v12  ;;  %v2361_v50 = vadd.f32 %v2353_v29, %v2345_v11  ;;  %v2349_v19 = vadd.f32 %v2337_v34, %v2316_v15  ;;  %v2742_v61 = vpop.f32.mrb[15].mxu1  ;;  %328 = sbr.rel (!%p326_p4) target bundleno = 16 (0x10), region = 108 }
 0x378   : >> { %2378 = vst [vmem:[%s4536_s20 + $0x10] sm:$0xff] %v2368_v25  ;;  %v2372_v58 = vmax.f32 %v2364_v10, 0.0  ;;  %v2369_v41 = vmax.f32 %v2361_v50, 0.0  ;;  %v2365_v45 = vadd.f32 %v2357_v62, %v2349_v19 }
 0x37a   : >> { %2382 = vst [vmem:[%s4536_s20 + $0x30] sm:$0xff] %v2372_v58  ;;  %2379 = vst [vmem:[%s4536_s20 + $0x18] sm:$0xff] %v2369_v41  ;;  %v2373_v57 = vmax.f32 %v2365_v45, 0.0 }
 0x37c   : >> { %2383 = vst [vmem:[%s4536_s20 + $0x38] sm:$0xff] %v2373_v57 }
 0x37d PF: > { %s18_s27 = sadd.s32 1, %s2790_s27  }
 0x37e   : > { %p15_p5 = scmp.ge.s32.totalorder %s18_s27, 6  }
 0x380   :  { %17 = sbr.rel (!%p15_p5) target bundleno = 1 (0x1), region = 119 }

</bundles_post_ra>
